<compile_context>
chip_gen: v5e
topology: v5e:2x2
jax: 0.10.0
libtpu: 0.0.40
codegen_flags: <defaults>
</compile_context>

<pallas_src>
import functools

import jax
import jax.numpy as jnp
from jax import lax
from jax.experimental import pallas as pl
from jax.experimental.pallas import tpu as pltpu


# Full-precision f32 MXU matmul settings (these matmuls are nowhere near the
# bottleneck, so precision costs nothing and keeps accuracy tight).
_F32_MXU = dict(preferred_element_type=jnp.float32,
                precision=lax.Precision.HIGHEST)


def attention_kernel(x_ref, batch_row_ref, w_ref, out_ref,
                     sums_ref, counts_ref, tg_ref, xcache_ref,
                     *, use_cache):
    # Grid = (phase, node tile).  The phase axis MUST stay outermost
    # (slowest-varying) so every phase-0 step runs (and tg_ref is finalized)
    # before any phase-1 step; scratch persists across all grid steps.
    phase = pl.program_id(0)
    t = pl.program_id(1)
    nt = pl.num_programs(1)

    num_graphs = out_ref.shape[0]
    tile_n = batch_row_ref.shape[1]

    # Lane-dense one-hot: onehot[g, n] = (batch[n] == g).  Nodes sit on the
    # 128-lane axis, so both scatter matmuls below are canonical
    # [B, TN] @ [TN, F] MXU matmuls.  Padding nodes carry graph id -1 and get
    # an all-zero one-hot column, so they contribute nothing to sums, counts
    # or the output scatter-add (the scatter is one-hot-gated, not
    # coefficient-gated, so their coefs = sigmoid(0) = 0.5 is never applied).
    b_row = batch_row_ref[...]                                     # [1, TN] i32
    iota_g = lax.broadcasted_iota(jnp.int32, (num_graphs, tile_n), 0)
    onehot = (b_row == iota_g).astype(jnp.float32)                 # [B, TN]

    # ---- phase 0: per-graph sums / counts, finalize tg = tanh(mean @ W) ----
    @pl.when(phase == 0)
    def _():
        x = x_ref[...]                                             # [TN, F] f32

        @pl.when(t == 0)
        def _():
            sums_ref[...] = jnp.zeros_like(sums_ref)
            counts_ref[...] = jnp.zeros_like(counts_ref)
            out_ref[...] = jnp.zeros_like(out_ref)

        # scatter-sum: [B, TN] @ [TN, F] on the MXU in f32.
        sums_ref[...] += jnp.dot(onehot, x, **_F32_MXU)
        # node counts per graph: cheap lane reduce, not a width-1 matmul.
        counts_ref[...] += jnp.sum(onehot, axis=1, keepdims=True)

        if use_cache:
            # Keep the tile resident in VMEM so phase 1 never re-streams x
            # from HBM (halves the dominant HBM traffic).
            xcache_ref[t] = x

        # finalize once: mean -> transformed_global = tanh(mean @ W)
        @pl.when(t == nt - 1)
        def _():
            mean = sums_ref[...] / jnp.maximum(counts_ref[...], 1.0)  # [B, F]
            tg_ref[...] = jnp.tanh(jnp.dot(mean, w_ref[...], **_F32_MXU))

    # ---- phase 1: attention coefficients + weighted scatter-add ------------
    @pl.when(phase == 1)
    def _():
        x = xcache_ref[t] if use_cache else x_ref[...]             # [TN, F]
        tg = tg_ref[...]                                           # [B, F]

        # d[g, n] = <tg[g, :], x[n, :]>  — NT-form matmul (same lowering as
        # the Q @ K^T used by flash attention), lane-dense output [B, TN].
        d = lax.dot_general(tg, x, (((1,), (1,)), ((), ())), **_F32_MXU)

        # Select d[batch[n], n] lane-dense: sublane reduce over the B axis.
        scores = jnp.sum(onehot * d, axis=0, keepdims=True)        # [1, TN]
        coefs = jax.nn.sigmoid(scores)                             # [1, TN]

        # Fold the coefficient into the one-hot instead of scaling x rows:
        # out += (onehot * coefs) @ x  — canonical [B, TN] @ [TN, F] matmul.
        out_ref[...] += jnp.dot(onehot * coefs, x, **_F32_MXU)


def attention_forward(x, batch, weight, num_graphs, *, tile_n=4096,
                      vmem_cache_budget_bytes=40 * 1024 * 1024):
    """SimGNN attention readout.

    x:      [N, F] float32 node features
    batch:  [N]    int32 graph id per node (values in [0, num_graphs))
    weight: [F, F] float32
    returns [num_graphs, F] float32
    """
    n, f = x.shape

    # Large node tiles amortize the ~0.35 us per-grid-step overhead (at F=32 a
    # 4096-node tile moves ~512 KB of x per step).  Keep tile_n a multiple of
    # 128 (lane width, required by the (1, tile_n) batch BlockSpec) and clamp
    # to the padded problem size so small problems do not over-pad.
    tile_n = max(128, (tile_n // 128) * 128)
    tile_n = min(tile_n, pl.cdiv(n, 128) * 128)
    # TODO(synk): for large num_graphs also cap tile_n so the in-kernel
    #   [B, tile_n] one-hot (B*tile_n*4 bytes) stays within vreg/VMEM budget,
    #   or switch to scalar-prefetched segment offsets (sorted batch), which
    #   removes the one-hot entirely and lets the graph axis run "parallel".

    num_tiles = pl.cdiv(n, tile_n)
    n_pad = num_tiles * tile_n

    batch = batch.astype(jnp.int32)
    if n_pad != n:
        # Padding nodes get graph id -1 -> all-zero one-hot column -> they
        # contribute nothing to sums, counts or the output scatter-add.
        x = jnp.pad(x, ((0, n_pad - n), (0, 0)))
        batch = jnp.pad(batch, (0, n_pad - n), constant_values=-1)

    batch_row = batch.reshape(1, n_pad)   # nodes on the lane axis

    # x-cache: keep all of x resident in VMEM so phase 1 does not re-stream it
    # from HBM.  Budget is v7x-safe (64 MiB physical VMEM); beyond it, fall
    # back to re-streaming x during phase 1.
    xcache_bytes = n_pad * f * 4
    use_cache = xcache_bytes <= vmem_cache_budget_bytes
    if use_cache:
        # Phase 1 holds block 0, so Pallas skips the x re-DMA entirely.
        x_map = lambda p, t: ((1 - p) * t, 0)
        xcache_shape = pltpu.VMEM((num_tiles, tile_n, f), jnp.float32)
    else:
        x_map = lambda p, t: (t, 0)
        xcache_shape = pltpu.VMEM((1, 8, 128), jnp.float32)   # unused dummy
    # TODO(synk): store the cache as bf16 (halves footprint, doubles the N
    #   that fits under v7x's budget) once phase-1 accuracy allows it.

    vmem_limit = int(min(100 * 1024 * 1024,
                         32 * 1024 * 1024 + (xcache_bytes if use_cache else 0)))

    grid = (2, num_tiles)                 # (phase, node tile), phase outermost

    kernel = functools.partial(attention_kernel, use_cache=use_cache)

    return pl.pallas_call(
        kernel,
        out_shape=jax.ShapeDtypeStruct((num_graphs, f), jnp.float32),
        grid_spec=pltpu.PrefetchScalarGridSpec(
            num_scalar_prefetch=0,
            grid=grid,
            in_specs=[
                pl.BlockSpec((tile_n, f), x_map),                 # x tile
                pl.BlockSpec((1, tile_n), lambda p, t: (0, t)),   # batch ids
                pl.BlockSpec((f, f), lambda p, t: (0, 0)),        # weight
            ],
            out_specs=pl.BlockSpec((num_graphs, f), lambda p, t: (0, 0)),
            scratch_shapes=[
                pltpu.VMEM((num_graphs, f), jnp.float32),   # per-graph sums
                pltpu.VMEM((num_graphs, 1), jnp.float32),   # per-graph counts
                pltpu.VMEM((num_graphs, f), jnp.float32),   # tanh(mean @ W)
                xcache_shape,                               # resident x cache
            ],
        ),
        compiler_params=pltpu.CompilerParams(
            # Both grid axes feed shared [B, F] accumulators (and phase 1
            # depends on phase-0 results), so both are sequential.
            dimension_semantics=("arbitrary", "arbitrary"),
            vmem_limit_bytes=vmem_limit,
        ),
    )(x, batch_row, weight)


def reference_forward(x, batch, weight, num_graphs):
    """Pure-JAX reference matching the PyTorch module semantics (f32)."""
    sums = jax.ops.segment_sum(x, batch, num_segments=num_graphs)
    counts = jax.ops.segment_sum(jnp.ones((x.shape[0],), x.dtype), batch,
                                 num_segments=num_graphs)
    mean = sums / jnp.maximum(counts, 1.0)[:, None]
    tg = jnp.tanh(mean @ weight)
    coefs = jax.nn.sigmoid(jnp.sum(x * tg[batch], axis=1))
    weighted = coefs[:, None] * x
    return jax.ops.segment_sum(weighted, batch, num_segments=num_graphs)


if __name__ == "__main__":
    # filters_3 = 32 features, 4 graphs, 200 nodes (not a tile multiple, so the
    # padding path is exercised).  tile_n defaults high and is clamped to the
    # padded problem size (256) -> grid = (2 phases, 1 tile), cache enabled.
    F, B = 32, 4
    sizes = [60, 50, 55, 35]
    N = sum(sizes)

    key = jax.random.PRNGKey(0)
    kx, kw = jax.random.split(key)
    x = jax.random.normal(kx, (N, F), dtype=jnp.float32)
    batch = jnp.concatenate(
        [jnp.full((c,), g, dtype=jnp.int32) for g, c in enumerate(sizes)])

    # Xavier-uniform init of the [F, F] weight matrix (deterministic).
    bound = (6.0 / (F + F)) ** 0.5
    weight = jax.random.uniform(kw, (F, F), dtype=jnp.float32,
                                minval=-bound, maxval=bound)

    out = attention_forward(x, batch, weight, B)
    out = jax.block_until_ready(out)

    ref = reference_forward(x, batch, weight, B)
    assert out.shape == (B, F)
    # All matmuls now run in f32 (HIGHEST precision), so the comparison against
    # the pure-f32 reference is tight.
    assert jnp.allclose(out, ref, atol=1e-3, rtol=1e-3), (
        "max abs diff = %f" % float(jnp.max(jnp.abs(out - ref))))

    print("KERNEL_OK")
</pallas_src>

<mosaic_0001>
module attributes {stable_mosaic.version = 11 : i64} {
  func.func @attention_kernel(%arg0: i32, %arg1: i32, %arg2: memref<256x32xf32, #tpu.memory_space<vmem>>, %arg3: memref<1x256xi32, #tpu.memory_space<vmem>>, %arg4: memref<32x32xf32, #tpu.memory_space<vmem>>, %arg5: memref<4x32xf32, #tpu.memory_space<vmem>>, %arg6: memref<4x32xf32, #tpu.memory_space<vmem>>, %arg7: memref<4x1xf32, #tpu.memory_space<vmem>>, %arg8: memref<4x32xf32, #tpu.memory_space<vmem>>, %arg9: memref<1x256x32xf32, #tpu.memory_space<vmem>>) attributes {dimension_semantics = [#tpu.dimension_semantics<arbitrary>, #tpu.dimension_semantics<arbitrary>], iteration_bounds = array<i64: 2, 1>, scalar_prefetch = 0 : i64, scratch_operands = 4 : i64, tpu.core_type = #tpu.core_type<tc>, window_params = [{transform_indices = @transform_0, window_bounds = array<i64: 256, 32>}, {transform_indices = @transform_1, window_bounds = array<i64: 1, 256>}, {pipeline_mode = #tpu.pipeline_mode<synchronous>, transform_indices = @transform_2, window_bounds = array<i64: 32, 32>}, {pipeline_mode = #tpu.pipeline_mode<synchronous>, transform_indices = @transform_3, window_bounds = array<i64: 4, 32>}]} {
    %c0 = arith.constant 0 : index
    %c0_0 = arith.constant 0 : index
    %0 = vector.load %arg3[%c0, %c0_0] : memref<1x256xi32, #tpu.memory_space<vmem>>, vector<1x256xi32>
    %1 = tpu.iota {dimensions = array<i32: 0>} : vector<4x256xi32>
    %2 = vector.broadcast %0 : vector<1x256xi32> to vector<4x256xi32>
    %3 = arith.cmpi eq, %2, %1 : vector<4x256xi32>
    %4 = arith.extui %3 : vector<4x256xi1> to vector<4x256xi32>
    %5 = arith.sitofp %4 : vector<4x256xi32> to vector<4x256xf32>
    %c0_i32 = arith.constant 0 : i32
    %6 = arith.cmpi eq, %arg0, %c0_i32 : i32
    %7 = arith.extui %6 : i1 to i32
    %c0_i32_1 = arith.constant 0 : i32
    %8 = arith.cmpi ne, %7, %c0_i32_1 : i32
    scf.if %8 {
      %c0_3 = arith.constant 0 : index
      %c0_4 = arith.constant 0 : index
      %12 = vector.load %arg2[%c0_3, %c0_4] : memref<256x32xf32, #tpu.memory_space<vmem>>, vector<256x32xf32>
      %c0_i32_5 = arith.constant 0 : i32
      %13 = arith.cmpi eq, %arg1, %c0_i32_5 : i32
      %14 = arith.extui %13 : i1 to i32
      %c0_i32_6 = arith.constant 0 : i32
      %15 = arith.cmpi ne, %14, %c0_i32_6 : i32
      scf.if %15 {
        %cst_20 = arith.constant 0.000000e+00 : f32
        %32 = vector.broadcast %cst_20 : f32 to vector<4x32xf32>
        %c0_21 = arith.constant 0 : index
        %c0_22 = arith.constant 0 : index
        %33 = vector.load %arg6[%c0_21, %c0_22] : memref<4x32xf32, #tpu.memory_space<vmem>>, vector<4x32xf32>
        tpu.vector_store %arg6[%c0_21, %c0_22], %32 {strides = array<i32>} : memref<4x32xf32, #tpu.memory_space<vmem>>, vector<4x32xf32>,
        %cst_23 = arith.constant 0.000000e+00 : f32
        %34 = vector.broadcast %cst_23 : f32 to vector<4x1xf32>
        %c0_24 = arith.constant 0 : index
        %c0_25 = arith.constant 0 : index
        %35 = vector.load %arg7[%c0_24, %c0_25] : memref<4x1xf32, #tpu.memory_space<vmem>>, vector<4x1xf32>
        tpu.vector_store %arg7[%c0_24, %c0_25], %34 {strides = array<i32>} : memref<4x1xf32, #tpu.memory_space<vmem>>, vector<4x1xf32>,
        %cst_26 = arith.constant 0.000000e+00 : f32
        %36 = vector.broadcast %cst_26 : f32 to vector<4x32xf32>
        %c0_27 = arith.constant 0 : index
        %c0_28 = arith.constant 0 : index
        %37 = vector.load %arg5[%c0_27, %c0_28] : memref<4x32xf32, #tpu.memory_space<vmem>>, vector<4x32xf32>
        tpu.vector_store %arg5[%c0_27, %c0_28], %36 {strides = array<i32>} : memref<4x32xf32, #tpu.memory_space<vmem>>, vector<4x32xf32>,
      } else {
      }
      %c0_7 = arith.constant 0 : index
      %c0_8 = arith.constant 0 : index
      %16 = vector.load %arg6[%c0_7, %c0_8] : memref<4x32xf32, #tpu.memory_space<vmem>>, vector<4x32xf32>
      %cst = arith.constant dense<0.000000e+00> : vector<4x32xf32>
      %17 = tpu.matmul %5, %12, %cst {dimension_numbers = #tpu.dot_dimension_numbers<[1], [0], [0], [1], [0, 0, 1, 1], [], []>, precision = #tpu.contract_precision<fp32>} : vector<4x256xf32>, vector<256x32xf32>, vector<4x32xf32> -> vector<4x32xf32>
      %18 = arith.addf %16, %17 : vector<4x32xf32>
      %c0_9 = arith.constant 0 : index
      %c0_10 = arith.constant 0 : index
      %19 = vector.load %arg6[%c0_9, %c0_10] : memref<4x32xf32, #tpu.memory_space<vmem>>, vector<4x32xf32>
      tpu.vector_store %arg6[%c0_9, %c0_10], %18 {strides = array<i32>} : memref<4x32xf32, #tpu.memory_space<vmem>>, vector<4x32xf32>,
      %c0_11 = arith.constant 0 : index
      %c0_12 = arith.constant 0 : index
      %20 = vector.load %arg7[%c0_11, %c0_12] : memref<4x1xf32, #tpu.memory_space<vmem>>, vector<4x1xf32>
      %cst_13 = arith.constant dense<0.000000e+00> : vector<4xf32>
      %21 = vector.multi_reduction <add>, %5, %cst_13 [1] : vector<4x256xf32> to vector<4xf32>
      %22 = vector.shape_cast %21 : vector<4xf32> to vector<4x1xf32>
      %23 = arith.addf %20, %22 : vector<4x1xf32>
      %c0_14 = arith.constant 0 : index
      %c0_15 = arith.constant 0 : index
      %24 = vector.load %arg7[%c0_14, %c0_15] : memref<4x1xf32, #tpu.memory_space<vmem>>, vector<4x1xf32>
      tpu.vector_store %arg7[%c0_14, %c0_15], %23 {strides = array<i32>} : memref<4x1xf32, #tpu.memory_space<vmem>>, vector<4x1xf32>,
      %25 = arith.index_cast %arg1 : i32 to index
      %c0_16 = arith.constant 0 : index
      %c0_17 = arith.constant 0 : index
      %26 = vector.load %arg9[%25, %c0_16, %c0_17] : memref<1x256x32xf32, #tpu.memory_space<vmem>>, vector<1x256x32xf32>
      %27 = vector.shape_cast %26 : vector<1x256x32xf32> to vector<256x32xf32>
      %28 = vector.shape_cast %12 : vector<256x32xf32> to vector<1x256x32xf32>
      tpu.vector_store %arg9[%25, %c0_16, %c0_17], %28 {strides = array<i32>} : memref<1x256x32xf32, #tpu.memory_space<vmem>>, vector<1x256x32xf32>,
      %c0_i32_18 = arith.constant 0 : i32
      %29 = arith.cmpi eq, %arg1, %c0_i32_18 : i32
      %30 = arith.extui %29 : i1 to i32
      %c0_i32_19 = arith.constant 0 : i32
      %31 = arith.cmpi ne, %30, %c0_i32_19 : i32
      scf.if %31 {
        %c0_20 = arith.constant 0 : index
        %c0_21 = arith.constant 0 : index
        %32 = vector.load %arg6[%c0_20, %c0_21] : memref<4x32xf32, #tpu.memory_space<vmem>>, vector<4x32xf32>
        %c0_22 = arith.constant 0 : index
        %c0_23 = arith.constant 0 : index
        %33 = vector.load %arg7[%c0_22, %c0_23] : memref<4x1xf32, #tpu.memory_space<vmem>>, vector<4x1xf32>
        %cst_24 = arith.constant 1.000000e+00 : f32
        %34 = vector.broadcast %cst_24 : f32 to vector<4x1xf32>
        %35 = arith.maximumf %33, %34 : vector<4x1xf32>
        %36 = vector.broadcast %35 : vector<4x1xf32> to vector<4x32xf32>
        %37 = arith.divf %32, %36 : vector<4x32xf32>
        %c0_25 = arith.constant 0 : index
        %c0_26 = arith.constant 0 : index
        %38 = vector.load %arg4[%c0_25, %c0_26] : memref<32x32xf32, #tpu.memory_space<vmem>>, vector<32x32xf32>
        %cst_27 = arith.constant dense<0.000000e+00> : vector<4x32xf32>
        %39 = tpu.matmul %37, %38, %cst_27 {dimension_numbers = #tpu.dot_dimension_numbers<[1], [0], [0], [1], [0, 0, 1, 1], [], []>, precision = #tpu.contract_precision<fp32>} : vector<4x32xf32>, vector<32x32xf32>, vector<4x32xf32> -> vector<4x32xf32>
        %40 = math.tanh %39 : vector<4x32xf32>
        %c0_28 = arith.constant 0 : index
        %c0_29 = arith.constant 0 : index
        %41 = vector.load %arg8[%c0_28, %c0_29] : memref<4x32xf32, #tpu.memory_space<vmem>>, vector<4x32xf32>
        tpu.vector_store %arg8[%c0_28, %c0_29], %40 {strides = array<i32>} : memref<4x32xf32, #tpu.memory_space<vmem>>, vector<4x32xf32>,
      } else {
      }
    } else {
    }
    %c1_i32 = arith.constant 1 : i32
    %9 = arith.cmpi eq, %arg0, %c1_i32 : i32
    %10 = arith.extui %9 : i1 to i32
    %c0_i32_2 = arith.constant 0 : i32
    %11 = arith.cmpi ne, %10, %c0_i32_2 : i32
    scf.if %11 {
      %12 = arith.index_cast %arg1 : i32 to index
      %c0_3 = arith.constant 0 : index
      %c0_4 = arith.constant 0 : index
      %13 = vector.load %arg9[%12, %c0_3, %c0_4] : memref<1x256x32xf32, #tpu.memory_space<vmem>>, vector<1x256x32xf32>
      %14 = vector.shape_cast %13 : vector<1x256x32xf32> to vector<256x32xf32>
      %c0_5 = arith.constant 0 : index
      %c0_6 = arith.constant 0 : index
      %15 = vector.load %arg8[%c0_5, %c0_6] : memref<4x32xf32, #tpu.memory_space<vmem>>, vector<4x32xf32>
      %cst = arith.constant dense<0.000000e+00> : vector<4x256xf32>
      %16 = tpu.matmul %15, %14, %cst {dimension_numbers = #tpu.dot_dimension_numbers<[1], [1], [0], [0], [0, 0, 1, 0], [], []>, precision = #tpu.contract_precision<fp32>} : vector<4x32xf32>, vector<256x32xf32>, vector<4x256xf32> -> vector<4x256xf32>
      %17 = arith.mulf %5, %16 : vector<4x256xf32>
      %cst_7 = arith.constant dense<0.000000e+00> : vector<256xf32>
      %18 = vector.multi_reduction <add>, %17, %cst_7 [0] : vector<4x256xf32> to vector<256xf32>
      %19 = vector.shape_cast %18 : vector<256xf32> to vector<1x256xf32>
      %20 = arith.negf %19 : vector<1x256xf32>
      %21 = math.exp %20 : vector<1x256xf32>
      %cst_8 = arith.constant 1.000000e+00 : f32
      %22 = vector.broadcast %cst_8 : f32 to vector<1x256xf32>
      %23 = arith.addf %22, %21 : vector<1x256xf32>
      %24 = arith.divf %22, %23 : vector<1x256xf32>
      %c0_9 = arith.constant 0 : index
      %c0_10 = arith.constant 0 : index
      %25 = vector.load %arg5[%c0_9, %c0_10] : memref<4x32xf32, #tpu.memory_space<vmem>>, vector<4x32xf32>
      %26 = vector.broadcast %24 : vector<1x256xf32> to vector<4x256xf32>
      %27 = arith.mulf %5, %26 : vector<4x256xf32>
      %cst_11 = arith.constant dense<0.000000e+00> : vector<4x32xf32>
      %28 = tpu.matmul %27, %14, %cst_11 {dimension_numbers = #tpu.dot_dimension_numbers<[1], [0], [0], [1], [0, 0, 1, 1], [], []>, precision = #tpu.contract_precision<fp32>} : vector<4x256xf32>, vector<256x32xf32>, vector<4x32xf32> -> vector<4x32xf32>
      %29 = arith.addf %25, %28 : vector<4x32xf32>
      %c0_12 = arith.constant 0 : index
      %c0_13 = arith.constant 0 : index
      %30 = vector.load %arg5[%c0_12, %c0_13] : memref<4x32xf32, #tpu.memory_space<vmem>>, vector<4x32xf32>
      tpu.vector_store %arg5[%c0_12, %c0_13], %29 {strides = array<i32>} : memref<4x32xf32, #tpu.memory_space<vmem>>, vector<4x32xf32>,
    } else {
    }
    return
  }
  func.func @transform_0(%arg0: i32, %arg1: i32) -> (i32, i32) {
    %c1_i32 = arith.constant 1 : i32
    %0 = arith.subi %c1_i32, %arg0 : i32
    %1 = arith.muli %0, %arg1 : i32
    %c0_i32 = arith.constant 0 : i32
    %c0_i32_0 = arith.constant 0 : i32
    return %1, %c0_i32 : i32, i32
  }
  func.func @transform_1(%arg0: i32, %arg1: i32) -> (i32, i32) {
    %c0_i32 = arith.constant 0 : i32
    %c0_i32_0 = arith.constant 0 : i32
    return %c0_i32, %arg1 : i32, i32
  }
  func.func @transform_2(%arg0: i32, %arg1: i32) -> (i32, i32) {
    %c0_i32 = arith.constant 0 : i32
    %c0_i32_0 = arith.constant 0 : i32
    %c0_i32_1 = arith.constant 0 : i32
    return %c0_i32, %c0_i32_0 : i32, i32
  }
  func.func @transform_3(%arg0: i32, %arg1: i32) -> (i32, i32) {
    %c0_i32 = arith.constant 0 : i32
    %c0_i32_0 = arith.constant 0 : i32
    %c0_i32_1 = arith.constant 0 : i32
    return %c0_i32, %c0_i32_0 : i32, i32
  }
}

</mosaic_0001>

<bundles_post_ra>
// kernel: tpu_custom_call.1
= control target key start
LH: loop header
LB: loop body
LE: loop exit
PB: predicated region body
PF: predicated region fallthrough
CT: control target
= control target key end

     0   :  { %8 = vsyncpa [#allocation7], 0  ;;  %s3003_s12 = smov 0   ;;  %s3005_s13 = smov 0   ;;  %s4800_s0 = inlined_call_operand.vmem [shape: f32[256,32], index: 0, kind: input, shape index: {}]   ;;  %s4801_s1 = inlined_call_operand.vmem [shape: s32[1,256], index: 1, kind: input, shape index: {}]   ;;  %s4802_s2 = inlined_call_operand.vmem [shape: f32[32,32], index: 2, kind: input, shape index: {}]   ;;  %s4803_s3 = inlined_call_operand.hbm [shape: f32[4,32], index: 3, kind: output, shape index: {}]  }
   0x1   :  { %s3007_s14 = smov 0  }
   0x2 LB: > { %s2848_s15 = sadd.s32 4294967295, %s2976_s14   ;;  %s26_s16 = sadd.s32 1, %s2972_s13  ;;  %s2976_s14 = sphi %s3007_s14, %s14_s14   ;;  %s2972_s13 = sphi %s3005_s13, %s5059_s13   ;;  %s2968_s12 = sphi %s3003_s12, %s5058_s12  }
   0x3   : > { %p28_p0 = scmp.ge.s32.totalorder %s26_s16, 2  ;;  %p2853_p1 = scmp.ge.s32.totalorder %s2976_s14, 1 }
   0x4   : > { %p164_p2 = scmp.lt.s32.totalorder %s2976_s14, 3 }
   0x5   : > { %s5061_s16 = smov (%p28_p0, %s26_s16), 0 }
   0x6   : > { %p165_p3 = pnand %p2853_p1, %p164_p2 }
   0x8   : > { %168 = sbr.rel (%p165_p3) target bundleno = 996 (0x3e4), region = 32 }
   0xd   : > { %v204_v0 = vld [vmem:[%s4801_s1] sm:$0x3]  ;;  %v205_v1 = vlaneseq  ;;  %v4910_v5 = vmov 0  ;;  %v4913_v6 = vmov 0  ;;  %v2978_v7 = vmov 0.0   ;;  %p2856_p4 = scmp.ne.s32.totalorder %s2968_s12, 0 }
   0xe   : > { %v207_v2 = vperm.slane %v204_v0, 0  ;;  %v208_v3 = vperm.slane %v204_v0, 1 }
   0xf   : > { %v206_v4 = vshrl.u32 %v205_v1, 7 }
  0x11   : > { %vm3027_vm0 = vcmp.eq.s32.totalorder %v207_v2, %v206_v4  ;;  %vm3031_vm1 = vcmp.eq.s32.totalorder %v208_v3, %v206_v4 }
  0x12   : > { %v4911_v5 = vsel %vm3027_vm0, 4294967295, %v4910_v5  ;;  %v4914_v6 = vsel %vm3031_vm1, 4294967295, %v4913_v6  ;;  %v3037_v8 = vsel %vm3027_vm0, 1.0, %v2978_v7  ;;  %v3041_v9 = vsel %vm3031_vm1, 1.0, %v2978_v7  ;;  %218 = sbr.rel (%p2856_p4) target bundleno = 446 (0x1be), region = 36 }
  0x13   : > { %4912 = vst [vmem:[#allocation9_spill] sm:$0xff] %v4911_v5 }
  0x14   : > { %4915 = vst [vmem:[#allocation10_spill] sm:$0xff] %v4914_v6 }
  0x15   : > { %4916 = vst [vmem:[#allocation11_spill] sm:$0xff] %v3037_v8 }
  0x16   : > { %4917 = vst [vmem:[#allocation12_spill] sm:$0xff] %v3041_v9 }
  0x17   : > { %vm947_vm2 = vcmask 1043456   ;;  %v234_v10 = vld [vmem:[%s4800_s0 + $0x78] sm:$0xff]  ;;  %vm958_vm3 = vcmask 261120   ;;  %v233_v11 = vld [vmem:[%s4800_s0 + $0x70] sm:$0xff]  ;;  %v232_v12 = vld [vmem:[%s4800_s0 + $0x68] sm:$0xff]  ;;  %vm257_vm4 = vcmask 3072  }
  0x18   : > { %v948_v13 = vsel %vm947_vm2, %v3037_v8, 0.0  ;;  %v949_v14 = vsel %vm947_vm2, %v3041_v9, 0.0  ;;  %v3055_v15 = vand.u32 4294901760, %v234_v10  ;;  %974 = vst.msk [vmem:[#allocation5 + $0x78] sm:$0xff] %vm958_vm3, %v234_v10  ;;  %v3058_v16 = vand.u32 4294901760, %v233_v11  ;;  %v231_v17 = vld [vmem:[%s4800_s0 + $0x60] sm:$0xff] }
  0x19   : > { %v950_v18 = vadd.f32 %v949_v14, %v948_v13  ;;  %973 = vst.msk [vmem:[#allocation5 + $0x70] sm:$0xff] %vm958_vm3, %v233_v11  ;;  %v3064_v19 = vand.u32 4294901760, %v232_v12  ;;  %v3066_v20 = vand.u32 4294901760, %v231_v17  ;;  %v230_v21 = vld [vmem:[%s4800_s0 + $0x58] sm:$0xff]  ;;  %v229_v22 = vld [vmem:[%s4800_s0 + $0x50] sm:$0xff]  ;;  %v228_v23 = vld [vmem:[%s4800_s0 + $0x48] sm:$0xff] }
  0x1a   : > { %v3078_v24 = vsub.f32 %v234_v10, %v3055_v15  ;;  %262 = vmatpush.msra.mxu0 %v3055_v15  ;;  %v3082_v25 = vsub.f32 %v233_v11, %v3058_v16  ;;  %458 = vmatpush.msra.mxu3 %v3055_v15  ;;  %972 = vst.msk [vmem:[#allocation5 + $0x68] sm:$0xff] %vm958_vm3, %v232_v12  ;;  %v3086_v26 = vand.u32 4294901760, %v230_v21  ;;  %v3088_v27 = vand.u32 4294901760, %v229_v22  ;;  %v227_v28 = vld [vmem:[%s4800_s0 + $0x40] sm:$0xff]  ;;  %v226_v37 = vld [vmem:[%s4800_s0 + $0x38] sm:$0xff]  ;;  %v225_v47 = vld [vmem:[%s4800_s0 + $0x30] sm:$0xff] }
  0x1b   : > { %951 = vadd.xlane.f32.xlu0 %v950_v18  ;;  %v3094_v29 = vsub.f32 %v232_v12, %v3064_v19  ;;  %v3097_v30 = vsub.f32 %v231_v17, %v3066_v20  ;;  %971 = vst.msk [vmem:[#allocation5 + $0x60] sm:$0xff] %vm958_vm3, %v231_v17  ;;  %v3100_v31 = vand.u32 4294901760, %v228_v23  ;;  %v3102_v32 = vand.u32 4294901760, %v227_v28  ;;  %v224_v52 = vld [vmem:[%s4800_s0 + $0x28] sm:$0xff]  ;;  %v223_v54 = vld [vmem:[%s4800_s0 + $0x20] sm:$0xff]  ;;  %v222_v61 = vld [vmem:[%s4800_s0 + $0x18] sm:$0xff] }
  0x1c   : > { %405 = vmatpush.msra.mxu2 %v3078_v24  ;;  %264 = vmatpush.msra.mxu0 %v3058_v16  ;;  %v4815_v33 = vand.u32 4294901760, %v3078_v24  ;;  %v4814_v34 = vand.u32 4294901760, %v3082_v25  ;;  %v3109_v35 = vsub.f32 %v230_v21, %v3086_v26  ;;  %970 = vst.msk [vmem:[#allocation5 + $0x58] sm:$0xff] %vm958_vm3, %v230_v21  ;;  %v3113_v36 = vsub.f32 %v229_v22, %v3088_v27  ;;  %v221_v2 = vld [vmem:[%s4800_s0 + $0x10] sm:$0xff]  ;;  %v220_v4 = vld [vmem:[%s4800_s0 + $0x8] sm:$0xff]  ;;  %v219_v13 = vld [vmem:[%s4800_s0] sm:$0xff] }
  0x1d   : > { %460 = vmatpush.msra.mxu3 %v3058_v16  ;;  %v4813_v38 = vand.u32 4294901760, %v3094_v29  ;;  %v4812_v39 = vand.u32 4294901760, %v3097_v30  ;;  %969 = vst.msk [vmem:[#allocation5 + $0x50] sm:$0xff] %vm958_vm3, %v229_v22  ;;  %v3123_v40 = vsub.f32 %v228_v23, %v3100_v31  ;;  %v3141_v46 = vand.u32 4294901760, %v226_v37  ;;  %v250_v14 = vld [vmem:[%s4800_s0 + $0xf8] sm:$0xff] }
  0x1e   : > { %408 = vmatpush.msra.mxu2 %v3082_v25  ;;  %v305_v41 = vsub.f32 %v3078_v24, %v4815_v33  ;;  %266 = vmatpush.msra.mxu0 %v3064_v19  ;;  %v311_v42 = vsub.f32 %v3082_v25, %v4814_v34  ;;  %v4810_v43 = vand.u32 4294901760, %v3109_v35  ;;  %968 = vst.msk [vmem:[#allocation5 + $0x48] sm:$0xff] %vm958_vm3, %v228_v23  ;;  %v4809_v45 = vand.u32 4294901760, %v3113_v36  ;;  %v3354_v33 = vld [vmem:[%s4800_s0 + $0xb0] sm:$0xff] }
  0x1f   : > { %462 = vmatpush.msra.mxu3 %v3064_v19  ;;  %v317_v44 = vsub.f32 %v3094_v29, %v4813_v38  ;;  %967 = vst.msk [vmem:[#allocation5 + $0x40] sm:$0xff] %vm958_vm3, %v227_v28  ;;  %v323_v50 = vsub.f32 %v3097_v30, %v4812_v39  ;;  %v3152_v51 = vsub.f32 %v227_v28, %v3102_v32  ;;  %v4808_v57 = vand.u32 4294901760, %v3123_v40  ;;  %v249_v28 = vld [vmem:[%s4800_s0 + $0xf0] sm:$0xff] }
  0x20   : > { %v306_v48 = vand.u32 4294901760, %v305_v41  ;;  %411 = vmatpush.msra.mxu2 %v3094_v29  ;;  %v312_v49 = vand.u32 4294901760, %v311_v42  ;;  %268 = vmatpush.msra.mxu0 %v3066_v20  ;;  %966 = vst.msk [vmem:[#allocation5 + $0x38] sm:$0xff] %vm958_vm3, %v226_v37  ;;  %v3160_v53 = vsub.f32 %v226_v37, %v3141_v46  ;;  %v329_v56 = vsub.f32 %v3109_v35, %v4810_v43  ;;  %v3327_v43 = vld [vmem:[%s4800_s0 + $0xc0] sm:$0xff] }
  0x21   : > { %464 = vmatpush.msra.mxu3 %v3066_v20  ;;  %965 = vst.msk [vmem:[#allocation5 + $0x30] sm:$0xff] %vm958_vm3, %v225_v47  ;;  %v318_v55 = vand.u32 4294901760, %v317_v44  ;;  %v3171_v58 = vand.u32 4294901760, %v225_v47  ;;  %v335_v59 = vsub.f32 %v3113_v36, %v4809_v45  ;;  %v3179_v60 = vand.u32 4294901760, %v224_v52 }
  0x22   : > { %307 = vmatpush.msra.mxu1 %v306_v48  ;;  %414 = vmatpush.msra.mxu2 %v3097_v30  ;;  %964 = vst.msk [vmem:[#allocation5 + $0x28] sm:$0xff] %vm958_vm3, %v224_v52  ;;  %v324_v62 = vand.u32 4294901760, %v323_v50  ;;  %v4807_v63 = vand.u32 4294901760, %v3152_v51  ;;  %v3190_v1 = vand.u32 4294901760, %v223_v54  ;;  %v4806_v3 = vand.u32 4294901760, %v3160_v53 }
  0x23   : > { %270 = vmatpush.msra.mxu0 %v3086_v26  ;;  %466 = vmatpush.msra.mxu3 %v3086_v26  ;;  %963 = vst.msk [vmem:[#allocation5 + $0x20] sm:$0xff] %vm958_vm3, %v223_v54  ;;  %v3188_v0 = vsub.f32 %v225_v47, %v3171_v58  ;;  %v330_v7 = vand.u32 4294901760, %v329_v56  ;;  %v341_v10 = vsub.f32 %v3123_v40, %v4808_v57  ;;  %v3210_v12 = vand.u32 4294901760, %v222_v61 }
  0x24   : > { %313 = vmatpush.msra.mxu1 %v312_v49  ;;  %417 = vmatpush.msra.mxu2 %v3109_v35  ;;  %962 = vst.msk [vmem:[#allocation5 + $0x18] sm:$0xff] %vm958_vm3, %v222_v61  ;;  %v3208_v11 = vsub.f32 %v224_v52, %v3179_v60  ;;  %v3221_v17 = vand.u32 4294901760, %v221_v2  ;;  %v336_v18 = vand.u32 4294901760, %v335_v59  ;;  %v347_v21 = vsub.f32 %v3152_v51, %v4807_v63  ;;  %v248_v49 = vld [vmem:[%s4800_s0 + $0xe8] sm:$0xff] }
  0x25   : > { %272 = vmatpush.msra.mxu0 %v3088_v27  ;;  %468 = vmatpush.msra.mxu3 %v3088_v27  ;;  %961 = vst.msk [vmem:[#allocation5 + $0x10] sm:$0xff] %vm958_vm3, %v221_v2  ;;  %v4804_v22 = vand.u32 4294901760, %v3188_v0  ;;  %v3230_v23 = vsub.f32 %v223_v54, %v3190_v1  ;;  %v353_v37 = vsub.f32 %v3160_v53, %v4806_v3  ;;  %v3241_v41 = vand.u32 4294901760, %v220_v4 }
  0x26   : > { %319 = vmatpush.msra.mxu1 %v318_v55  ;;  %420 = vmatpush.msra.mxu2 %v3113_v36  ;;  %4918 = vst [vmem:[#allocation13_spill] sm:$0xff] %v3210_v12  ;;  %v3243_v42 = vand.u32 4294901760, %v250_v14  ;;  %v342_v44 = vand.u32 4294901760, %v341_v10  ;;  %v4805_v47 = vand.u32 4294901760, %v3208_v11  ;;  %v3248_v48 = vsub.f32 %v222_v61, %v3210_v12  ;;  %v247_v55 = vld [vmem:[%s4800_s0 + $0xe0] sm:$0xff] }
  0x27   : > { %960 = vst.msk [vmem:[#allocation5 + $0x8] sm:$0xff] %vm958_vm3, %v220_v4  ;;  %274 = vmatpush.msra.mxu0 %v3100_v31  ;;  %470 = vmatpush.msra.mxu3 %v3100_v31  ;;  %v3256_v50 = vsub.f32 %v221_v2, %v3221_v17  ;;  %v3258_v52 = vand.u32 4294901760, %v219_v13  ;;  %v3260_v54 = vand.u32 4294901760, %v249_v28  ;;  %v348_v56 = vand.u32 4294901760, %v347_v21  ;;  %v246_v2 = vld [vmem:[%s4800_s0 + $0xd8] sm:$0xff] }
  0x28   : > { %4919 = vst [vmem:[#allocation14_spill] sm:$0xff] %v3221_v17  ;;  %325 = vmatpush.msra.mxu1 %v324_v62  ;;  %423 = vmatpush.msra.mxu2 %v3123_v40  ;;  %v359_v59 = vsub.f32 %v3188_v0, %v4804_v22  ;;  %v4811_v61 = vand.u32 4294901760, %v3230_v23  ;;  %v3272_v62 = vsub.f32 %v250_v14, %v3243_v42  ;;  %v4816_v21 = vand.u32 4294901760, %v3248_v48 }
  0x29   : > { %959 = vst.msk [vmem:[#allocation5] sm:$0xff] %vm958_vm3, %v219_v13  ;;  %276 = vmatpush.msra.mxu0 %v3102_v32  ;;  %472 = vmatpush.msra.mxu3 %v3102_v32  ;;  %v3281_v10 = vsub.f32 %v220_v4, %v3241_v41  ;;  %v3294_v22 = vand.u32 4294901760, %v247_v55  ;;  %v245_v4 = vld [vmem:[%s4800_s0 + $0xd0] sm:$0xff]  ;;  %v3306_v3 = vand.u32 4294901760, %v246_v2  ;;  %vm255_vm5 = vcmask 257024  }
  0x2a   : > { %990 = vst.msk [vmem:[#allocation5 + $0xf8] sm:$0xff] %vm958_vm3, %v250_v14  ;;  %331 = vmatpush.msra.mxu1 %v330_v7  ;;  %426 = vmatpush.msra.mxu2 %v3152_v51  ;;  %v354_v7 = vand.u32 4294901760, %v353_v37  ;;  %v365_v14 = vsub.f32 %v3208_v11, %v4805_v47  ;;  %v3292_v37 = vsub.f32 %v249_v28, %v3260_v54  ;;  %v360_v63 = vand.u32 4294901760, %v359_v59 }
  0x2b   : > { %4920 = vst [vmem:[#allocation15_spill] sm:$0xff] %v3241_v41  ;;  %278 = vmatpush.msra.mxu0 %v3141_v46  ;;  %474 = vmatpush.msra.mxu3 %v3141_v46  ;;  %v3304_v47 = vsub.f32 %v219_v13, %v3258_v52  ;;  %v371_v57 = vsub.f32 %v3230_v23, %v4811_v61  ;;  %v4818_v13 = vand.u32 4294901760, %v3272_v62  ;;  %v3332_v59 = vand.u32 4294901760, %v245_v4 }
  0x2c   : > { %4921 = vst [vmem:[#allocation16_spill] sm:$0xff] %v3258_v52  ;;  %337 = vmatpush.msra.mxu1 %v336_v18  ;;  %429 = vmatpush.msra.mxu2 %v3160_v53  ;;  %v3283_v18 = vand.u32 4294901760, %v248_v49  ;;  %v366_v61 = vand.u32 4294901760, %v365_v14  ;;  %v377_v39 = vsub.f32 %v3248_v48, %v4816_v21  ;;  %v3347_v34 = vsub.f32 %v247_v55, %v3294_v22  ;;  %v3370_v21 = vld [vmem:[%s4800_s0 + $0xa8] sm:$0xff]  ;;  %v3400_v14 = vld [vmem:[%s4800_s0 + $0x98] sm:$0xff] }
  0x2d   : > { %989 = vst.msk [vmem:[#allocation5 + $0xf0] sm:$0xff] %vm958_vm3, %v249_v28  ;;  %280 = vmatpush.msra.mxu0 %v3171_v58  ;;  %476 = vmatpush.msra.mxu3 %v3171_v58  ;;  %v3312_v28 = vld [vmem:[%s4800_s0 + $0xc8] sm:$0xff]  ;;  %v372_v38 = vand.u32 4294901760, %v371_v57  ;;  %v4928_v57 = vand.u32 4294901760, %v3281_v10  ;;  %v4929_v9 = vand.u32 4294901760, %v3292_v37 }
  0x2e   : > { %4922 = vst [vmem:[#allocation17_spill] sm:$0xff] %v3272_v62  ;;  %343 = vmatpush.msra.mxu1 %v342_v44  ;;  %432 = vmatpush.msra.mxu2 %v3188_v0  ;;  %v4817_v44 = vand.u32 4294901760, %v3256_v50  ;;  %v3320_v45 = vsub.f32 %v248_v49, %v3283_v18  ;;  %v378_v6 = vand.u32 4294901760, %v377_v39 }
  0x2f   : > { %988 = vst.msk [vmem:[#allocation5 + $0xe8] sm:$0xff] %vm958_vm3, %v248_v49  ;;  %282 = vmatpush.msra.mxu0 %v3179_v60  ;;  %478 = vmatpush.msra.mxu3 %v3179_v60  ;;  %v3339_v49 = vld [vmem:[%s4800_s0 + $0xb8] sm:$0xff]  ;;  %v652_v5 = vsub.f32 %v3292_v37, %v4929_v9  ;;  %v4930_v9 = vand.u32 4294901760, %v3304_v47 }
  0x30   : > { %4923 = vst [vmem:[#allocation18_spill] sm:$0xff] %v3281_v10  ;;  %349 = vmatpush.msra.mxu1 %v348_v56  ;;  %435 = vmatpush.msra.mxu2 %v3208_v11  ;;  %v3385_v56 = vld [vmem:[%s4800_s0 + $0xa0] sm:$0xff] }
  0x31   : > { %987 = vst.msk [vmem:[#allocation5 + $0xe0] sm:$0xff] %vm958_vm3, %v247_v55  ;;  %284 = vmatpush.msra.mxu0 %v3190_v1  ;;  %480 = vmatpush.msra.mxu3 %v3190_v1  ;;  %v3363_v55 = vsub.f32 %v246_v2, %v3306_v3 }
  0x32   : > { %4924 = vst [vmem:[#allocation19_spill] sm:$0xff] %v3292_v37  ;;  %355 = vmatpush.msra.mxu1 %v354_v7  ;;  %438 = vmatpush.msra.mxu2 %v3230_v23  ;;  %v383_v7 = vsub.f32 %v3256_v50, %v4817_v44  ;;  %v646_v44 = vsub.f32 %v3272_v62, %v4818_v13  ;;  %v3415_v62 = vld [vmem:[%s4800_s0 + $0x90] sm:$0xff]  ;;  %v3428_v37 = vld [vmem:[%s4800_s0 + $0x88] sm:$0xff] }
  0x33   : > { %986 = vst.msk [vmem:[#allocation5 + $0xd8] sm:$0xff] %vm958_vm3, %v246_v2  ;;  %286 = vmatpush.msra.mxu0 %v3210_v12  ;;  %482 = vmatpush.msra.mxu3 %v3210_v12  ;;  %v3378_v2 = vand.u32 4294901760, %v3312_v28  ;;  %v3393_v13 = vsub.f32 %v245_v4, %v3332_v59 }
  0x34   : > { %4925 = vst [vmem:[#allocation20_spill] sm:$0xff] %v3304_v47  ;;  %361 = vmatpush.msra.mxu1 %v360_v63  ;;  %441 = vmatpush.msra.mxu2 %v3248_v48  ;;  %v389_v63 = vsub.f32 %v3281_v10, %v4928_v57  ;;  %v384_v39 = vand.u32 4294901760, %v383_v7  ;;  %v647_v7 = vand.u32 4294901760, %v646_v44  ;;  %v3439_v57 = vand.u32 4294901760, %v3339_v49 }
  0x35   : > { %985 = vst.msk [vmem:[#allocation5 + $0xd0] sm:$0xff] %vm958_vm3, %v245_v4  ;;  %288 = vmatpush.msra.mxu0 %v3221_v17  ;;  %484 = vmatpush.msra.mxu3 %v3221_v17  ;;  %v3408_v4 = vand.u32 4294901760, %v3327_v43 }
  0x36   : > { %4926 = vst [vmem:[#allocation21_spill] sm:$0xff] %v3320_v45  ;;  %367 = vmatpush.msra.mxu1 %v366_v61  ;;  %444 = vmatpush.msra.mxu2 %v3256_v50  ;;  %v395_v61 = vsub.f32 %v3304_v47, %v4930_v9  ;;  %v3436_v9 = vsub.f32 %v3312_v28, %v3378_v2  ;;  %v390_v44 = vand.u32 4294901760, %v389_v63  ;;  %v3462_v63 = vand.u32 4294901760, %v3354_v33 }
  0x37   : > { %984 = vst.msk [vmem:[#allocation5 + $0xc8] sm:$0xff] %vm958_vm3, %v3312_v28  ;;  %290 = vmatpush.msra.mxu0 %v3241_v41  ;;  %486 = vmatpush.msra.mxu3 %v3241_v41  ;;  %v4931_v41 = vand.u32 4294901760, %v3320_v45  ;;  %v653_v28 = vand.u32 4294901760, %v652_v5 }
  0x38   : > { %983 = vst.msk [vmem:[#allocation5 + $0xc0] sm:$0xff] %vm958_vm3, %v3327_v43  ;;  %373 = vmatpush.msra.mxu1 %v372_v38  ;;  %447 = vmatpush.msra.mxu2 %v3281_v10  ;;  %v3446_v38 = vld [vmem:[%s4800_s0 + $0x80] sm:$0xff]  ;;  %v3459_v10 = vsub.f32 %v3327_v43, %v3408_v4  ;;  %v3473_v43 = vsub.f32 %v3339_v49, %v3439_v57 }
  0x39   : > { %4927 = vst [vmem:[#allocation22_spill] sm:$0xff] %v3347_v34  ;;  %v658_v17 = vsub.f32 %v3320_v45, %v4931_v41  ;;  %292 = vmatpush.msra.mxu0 %v3258_v52  ;;  %488 = vmatpush.msra.mxu3 %v3258_v52  ;;  %v4932_v45 = vand.u32 4294901760, %v3347_v34  ;;  %v4933_v41 = vand.u32 4294901760, %v3078_v24  ;;  %v4934_v52 = vand.u32 4294901760, %v3363_v55 }
  0x3a   : > { %982 = vst.msk [vmem:[#allocation5 + $0xb8] sm:$0xff] %vm958_vm3, %v3339_v49  ;;  %379 = vmatpush.msra.mxu1 %v378_v6  ;;  %450 = vmatpush.msra.mxu2 %v3304_v47  ;;  %v396_v6 = vand.u32 4294901760, %v395_v61  ;;  %v3476_v47 = vand.u32 4294901760, %v3370_v21  ;;  %v4935_v24 = vand.u32 4294901760, %v3082_v25  ;;  %v4936_v61 = vand.u32 4294901760, %v3393_v13 }
  0x3b   : > { %981 = vst.msk [vmem:[#allocation5 + $0xb0] sm:$0xff] %vm958_vm3, %v3354_v33  ;;  %v664_v12 = vsub.f32 %v3347_v34, %v4932_v45  ;;  %499 = vmatpush.msrb.mxu0 %v4933_v41  ;;  %v670_v5 = vsub.f32 %v3363_v55, %v4934_v52  ;;  %648 = vmatpush.msrb.mxu3 %v647_v7  ;;  %v659_v45 = vand.u32 4294901760, %v658_v17  ;;  %v681_v34 = vand.u32 4294901760, %v3436_v9 }
  0x3c   : > { %980 = vst.msk [vmem:[#allocation5 + $0xa8] sm:$0xff] %vm958_vm3, %v3370_v21  ;;  %603 = vmatpush.msrb.mxu2 %v3243_v42  ;;  %385 = vmatpush.msra.mxu1 %v384_v39  ;;  %v676_v52 = vsub.f32 %v3393_v13, %v4936_v61  ;;  %v687_v39 = vand.u32 4294901760, %v3459_v10  ;;  %v3487_v49 = vsub.f32 %v3354_v33, %v3462_v63  ;;  %v3490_v7 = vand.u32 4294901760, %v3385_v56 }
  0x3d   : > { %979 = vst.msk [vmem:[#allocation5 + $0xa0] sm:$0xff] %vm958_vm3, %v3385_v56  ;;  %503 = vmatpush.msrb.mxu0 %v4935_v24  ;;  %654 = vmatpush.msrb.mxu3 %v653_v28  ;;  %v665_v17 = vand.u32 4294901760, %v664_v12  ;;  %v4937_v25 = vand.u32 4294901760, %v3094_v29  ;;  %v3496_v41 = vand.u32 4294901760, %v3400_v14  ;;  %v671_v12 = vand.u32 4294901760, %v670_v5 }
  0x3e   : > { %978 = vst.msk [vmem:[#allocation5 + $0x98] sm:$0xff] %vm958_vm3, %v3400_v14  ;;  %605 = vmatpush.msrb.mxu2 %v3260_v54  ;;  %391 = vmatpush.msra.mxu1 %v390_v44  ;;  %v682_v44 = vsub.f32 %v3436_v9, %v681_v34  ;;  %v693_v33 = vand.u32 4294901760, %v3473_v43  ;;  %v3504_v28 = vsub.f32 %v3370_v21, %v3476_v47  ;;  %v677_v29 = vand.u32 4294901760, %v676_v52 }
  0x3f   : > { %977 = vst.msk [vmem:[#allocation5 + $0x90] sm:$0xff] %vm958_vm3, %v3415_v62  ;;  %507 = vmatpush.msrb.mxu0 %v4937_v25  ;;  %660 = vmatpush.msrb.mxu3 %v659_v45  ;;  %v4938_v24 = vand.u32 4294901760, %v3097_v30  ;;  %v699_v5 = vand.u32 4294901760, %v3487_v49  ;;  %v3516_v45 = vsub.f32 %v3385_v56, %v3490_v7  ;;  %v3519_v21 = vand.u32 4294901760, %v3415_v62 }
  0x40   : > { %976 = vst.msk [vmem:[#allocation5 + $0x88] sm:$0xff] %vm958_vm3, %v3428_v37  ;;  %607 = vmatpush.msrb.mxu2 %v3283_v18  ;;  %397 = vmatpush.msra.mxu1 %v396_v6  ;;  %v688_v6 = vsub.f32 %v3459_v10, %v687_v39  ;;  %v4939_v30 = vand.u32 4294901760, %v3109_v35  ;;  %v683_v61 = vand.u32 4294901760, %v682_v44  ;;  %v694_v56 = vsub.f32 %v3473_v43, %v693_v33 }
  0x41   : > { %975 = vst.msk [vmem:[#allocation5 + $0x80] sm:$0xff] %vm958_vm3, %v3446_v38  ;;  %511 = vmatpush.msrb.mxu0 %v4938_v24  ;;  %666 = vmatpush.msrb.mxu3 %v665_v17  ;;  %v705_v52 = vand.u32 4294901760, %v3504_v28  ;;  %v3534_v17 = vand.u32 4294901760, %v3428_v37  ;;  %v711_v25 = vand.u32 4294901760, %v3516_v45  ;;  %v3557_v24 = vand.u32 4294901760, %v3446_v38 }
  0x42   : > { %566 = vmatpush.msrb.mxu1 %v3055_v15  ;;  %609 = vmatpush.msrb.mxu2 %v3294_v22  ;;  %v3525_v15 = vsub.f32 %v3400_v14, %v3496_v41  ;;  %v689_v35 = vand.u32 4294901760, %v688_v6  ;;  %v700_v14 = vsub.f32 %v3487_v49, %v699_v5  ;;  %v695_v44 = vand.u32 4294901760, %v694_v56 }
  0x43   : > { %515 = vmatpush.msrb.mxu0 %v4939_v30  ;;  %672 = vmatpush.msrb.mxu3 %v671_v12  ;;  %v3546_v12 = vsub.f32 %v3415_v62, %v3519_v21  ;;  %v3561_v62 = vsub.f32 %v3428_v37, %v3534_v17  ;;  %v712_v6 = vsub.f32 %v3516_v45, %v711_v25  ;;  %v4943_v37 = vand.u32 4294901760, %v3160_v53 }
  0x44   : > { %568 = vmatpush.msrb.mxu1 %v3058_v16  ;;  %611 = vmatpush.msrb.mxu2 %v3306_v3  ;;  %v4940_v16 = vand.u32 4294901760, %v3113_v36  ;;  %v4941_v36 = vand.u32 4294901760, %v3123_v40  ;;  %v701_v40 = vand.u32 4294901760, %v700_v14  ;;  %v294_v56 = vsub.f32 %v3037_v8, %v3037_v8 }
  0x45   : > { %678 = vmatpush.msrb.mxu3 %v677_v29  ;;  %v706_v29 = vsub.f32 %v3504_v28, %v705_v52  ;;  %v723_v30 = vand.u32 4294901760, %v3546_v12  ;;  %v713_v53 = vand.u32 4294901760, %v712_v6 }
  0x46   : > { %570 = vmatpush.msrb.mxu1 %v3064_v19  ;;  %613 = vmatpush.msrb.mxu2 %v3332_v59  ;;  %v717_v19 = vand.u32 4294901760, %v3525_v15 }
  0x47   : > { %519 = vmatpush.msrb.mxu0 %v4940_v16  ;;  %684 = vmatpush.msrb.mxu3 %v683_v61  ;;  %v729_v61 = vand.u32 4294901760, %v3561_v62  ;;  %v3583_v16 = vsub.f32 %v3446_v38, %v3557_v24  ;;  %v4945_v38 = vand.u32 4294901760, %v3208_v11  ;;  %v4947_v11 = vand.u32 4294901760, %v3248_v48 }
  0x48   : > { %572 = vmatpush.msrb.mxu1 %v3066_v20  ;;  %615 = vmatpush.msrb.mxu2 %v3378_v2  ;;  %v4942_v20 = vand.u32 4294901760, %v3152_v51  ;;  %v707_v51 = vand.u32 4294901760, %v706_v29 }
  0x49   : > { %523 = vmatpush.msrb.mxu0 %v4941_v36  ;;  %690 = vmatpush.msrb.mxu3 %v689_v35  ;;  %v724_v35 = vsub.f32 %v3546_v12, %v723_v30  ;;  %v735_v14 = vand.u32 4294901760, %v3583_v16  ;;  %v295_v36 = vand.u32 4294901760, %v294_v56 }
  0x4a   : > { %574 = vmatpush.msrb.mxu1 %v3086_v26  ;;  %617 = vmatpush.msrb.mxu2 %v3408_v4  ;;  %v718_v26 = vsub.f32 %v3525_v15, %v717_v19 }
  0x4b   : > { %527 = vmatpush.msrb.mxu0 %v4942_v20  ;;  %696 = vmatpush.msrb.mxu3 %v695_v44  ;;  %v725_v44 = vand.u32 4294901760, %v724_v35  ;;  %v296_v20 = vsub.f32 %v294_v56, %v295_v36 }
  0x4c   : > { %576 = vmatpush.msrb.mxu1 %v3088_v27  ;;  %619 = vmatpush.msrb.mxu2 %v3439_v57  ;;  %v4944_v27 = vand.u32 4294901760, %v3188_v0  ;;  %v730_v0 = vsub.f32 %v3561_v62, %v729_v61 }
  0x4d   : > { %531 = vmatpush.msrb.mxu0 %v4943_v37  ;;  %702 = vmatpush.msrb.mxu3 %v701_v40  ;;  %v297_v6 = vand.u32 4294901760, %v296_v20 }
  0x4e   : > { %578 = vmatpush.msrb.mxu1 %v3100_v31  ;;  %621 = vmatpush.msrb.mxu2 %v3462_v63  ;;  %v719_v31 = vand.u32 4294901760, %v718_v26  ;;  %v731_v29 = vand.u32 4294901760, %v730_v0  ;;  %v4951_v26 = vld [vmem:[#allocation13_spill] sm:$0xff] }
  0x4f   : > { %535 = vmatpush.msrb.mxu0 %v4944_v27  ;;  %708 = vmatpush.msrb.mxu3 %v707_v51  ;;  %v4955_v51 = vld [vmem:[#allocation17_spill] sm:$0xff]  ;;  %v4957_v27 = vld [vmem:[#allocation15_spill] sm:$0xff] }
  0x50   : > { %580 = vmatpush.msrb.mxu1 %v3102_v32  ;;  %623 = vmatpush.msrb.mxu2 %v3476_v47  ;;  %v4946_v32 = vand.u32 4294901760, %v3230_v23  ;;  %v4948_v23 = vand.u32 4294901760, %v3256_v50  ;;  %v4954_v50 = vld [vmem:[#allocation14_spill] sm:$0xff]  ;;  %v4962_v0 = vld [vmem:[#allocation21_spill] sm:$0xff] }
  0x51   : > { %539 = vmatpush.msrb.mxu0 %v4945_v38  ;;  %714 = vmatpush.msrb.mxu3 %v713_v53  ;;  %v4958_v53 = vld [vmem:[#allocation19_spill] sm:$0xff]  ;;  %v2979_v38 = vmov 1.0  }
  0x52   : > { %582 = vmatpush.msrb.mxu1 %v3141_v46  ;;  %625 = vmatpush.msrb.mxu2 %v3490_v7  ;;  %v736_v46 = vsub.f32 %v3583_v16, %v735_v14  ;;  %v4959_v35 = vand.u32 4294901760, %v4958_v53 }
  0x53   : > { %543 = vmatpush.msrb.mxu0 %v4946_v32  ;;  %720 = vmatpush.msrb.mxu3 %v719_v31  ;;  %v4964_v32 = vld [vmem:[#allocation22_spill] sm:$0xff] }
  0x54   : > { %584 = vmatpush.msrb.mxu1 %v3171_v58  ;;  %627 = vmatpush.msrb.mxu2 %v3496_v41  ;;  %v4949_v58 = vld [vmem:[#allocation18_spill] sm:$0xff]  ;;  %v737_v40 = vand.u32 4294901760, %v736_v46 }
  0x55   : > { %547 = vmatpush.msrb.mxu0 %v4947_v11  ;;  %726 = vmatpush.msrb.mxu3 %v725_v44  ;;  %v4950_v48 = vand.u32 4294901760, %v4949_v58  ;;  %v4965_v44 = vand.u32 4294901760, %v4964_v32  ;;  %v4966_v11 = vld [vmem:[#allocation12_spill] sm:$0xff] }
  0x56   : > { %586 = vmatpush.msrb.mxu1 %v3179_v60  ;;  %629 = vmatpush.msrb.mxu2 %v3519_v21  ;;  %v4952_v60 = vld [vmem:[#allocation20_spill] sm:$0xff] }
  0x57   : > { %551 = vmatpush.msrb.mxu0 %v4948_v23  ;;  %732 = vmatpush.msrb.mxu3 %v731_v29  ;;  %v4953_v37 = vand.u32 4294901760, %v4952_v60  ;;  %v3648_v29 = vsub.f32 %v4966_v11, %v4966_v11 }
  0x58   : > { %588 = vmatpush.msrb.mxu1 %v3190_v1  ;;  %631 = vmatpush.msrb.mxu2 %v3534_v17  ;;  %v4956_v1 = vand.u32 4294901760, %v4955_v51 }
  0x59   : > { %555 = vmatpush.msrb.mxu0 %v4950_v48  ;;  %453 = vmatmul.f32.vlgmr.msra.gmra.mxu2 %v294_v56  ;;  %v4960_v56 = vld [vmem:[#allocation16_spill] sm:$0xff]  ;;  %v636_v46 = vand.u32 4294901760, %v3648_v29 }
  0x5a   : > { %590 = vmatpush.msrb.mxu1 %v4951_v26  ;;  %633 = vmatpush.msrb.mxu2 %v3557_v24 }
  0x5b   : > { %559 = vmatpush.msrb.mxu0 %v4953_v37  ;;  %738 = vmatpush.msrb.mxu3 %v737_v40 }
  0x5c   : > { %592 = vmatpush.msrb.mxu1 %v4954_v50  ;;  %840 = vmatpush.msra.mxu2 %v4956_v1 }
  0x5d   : > { %298 = vmatmul.f32.vlgmr.msra.gmra.mxu0 %v297_v6  ;;  %492 = vmatmul.f32.vlgmr.msra.gmra.mxu3 %v295_v36  ;;  %v4963_v36 = vand.u32 4294901760, %v4962_v0 }
  0x5e   : > { %594 = vmatpush.msrb.mxu1 %v4957_v27  ;;  %746 = vmatpush.msra.mxu0 %v4955_v51 }
  0x5f   : > { %844 = vmatpush.msra.mxu2 %v4959_v35  ;;  %907 = vmatpush.msra.mxu3 %v3243_v42 }
  0x60   : > { %596 = vmatpush.msrb.mxu1 %v4960_v56  ;;  %749 = vmatpush.msra.mxu0 %v4958_v53 }
  0x61   : > { %2857 = vmatmul.msk.f32.vlgmr.msra.gmra.mxu1 %vm3027_vm0, %v2979_v38  ;;  %848 = vmatpush.msra.mxu2 %v4963_v36 }
  0x62   : > { %799 = vmatpush.msra.mxu1 %v3243_v42  ;;  %909 = vmatpush.msra.mxu3 %v3260_v54  ;;  %v4967_v42 = vand.u32 4294901760, %v3363_v55 }
  0x63   : > { %752 = vmatpush.msra.mxu0 %v4962_v0  ;;  %852 = vmatpush.msra.mxu2 %v4965_v44 }
  0x64   : > { %801 = vmatpush.msra.mxu1 %v3260_v54  ;;  %911 = vmatpush.msra.mxu3 %v3283_v18  ;;  %v4968_v54 = vand.u32 4294901760, %v3393_v13 }
  0x65   : > { %755 = vmatpush.msra.mxu0 %v4964_v32  ;;  %856 = vmatpush.msra.mxu2 %v4967_v42 }
  0x66   : > { %803 = vmatpush.msra.mxu1 %v3283_v18  ;;  %913 = vmatpush.msra.mxu3 %v3294_v22 }
  0x67   : > { %758 = vmatpush.msra.mxu0 %v3363_v55  ;;  %860 = vmatpush.msra.mxu2 %v4968_v54 }
  0x68   : > { %805 = vmatpush.msra.mxu1 %v3294_v22  ;;  %915 = vmatpush.msra.mxu3 %v3306_v3  ;;  %v2980_v22 = vmov 0.0  }
  0x69   : > { %761 = vmatpush.msra.mxu0 %v3393_v13  ;;  %864 = vmatpush.msra.mxu2 %v681_v34  ;;  %258 = vst.msk [vmem:[#allocation3] sm:$0xf] %vm257_vm4, %v2980_v22 }
  0x6a   : > { %807 = vmatpush.msra.mxu1 %v3306_v3  ;;  %917 = vmatpush.msra.mxu3 %v3332_v59  ;;  %v637_v3 = vsub.f32 %v3648_v29, %v636_v46  ;;  %256 = vst.msk [vmem:[#allocation2] sm:$0xf] %vm255_vm5, %v2980_v22 }
  0x6b   : > { %764 = vmatpush.msra.mxu0 %v3436_v9  ;;  %868 = vmatpush.msra.mxu2 %v687_v39  ;;  %259 = vst.msk [vmem:[#allocation6] sm:$0xf] %vm255_vm5, %v2980_v22 }
  0x6c   : > { %809 = vmatpush.msra.mxu1 %v3332_v59  ;;  %919 = vmatpush.msra.mxu3 %v3378_v2  ;;  %v638_v34 = vand.u32 4294901760, %v637_v3 }
  0x6d   : > { %767 = vmatpush.msra.mxu0 %v3459_v10  ;;  %872 = vmatpush.msra.mxu2 %v693_v33  ;;  %v1020_v33 = vld [vmem:[%s4802_s2 + $0x18] sm:$0xff] }
  0x6e   : > { %811 = vmatpush.msra.mxu1 %v3378_v2  ;;  %921 = vmatpush.msra.mxu3 %v3408_v4 }
  0x6f   : > { %770 = vmatpush.msra.mxu0 %v3473_v43  ;;  %876 = vmatpush.msra.mxu2 %v699_v5 }
  0x70   : > { %813 = vmatpush.msra.mxu1 %v3408_v4  ;;  %923 = vmatpush.msra.mxu3 %v3439_v57  ;;  %v946_v18 = vld [vmem:[#allocation3] sm:$0xf] }
  0x71   : > { %773 = vmatpush.msra.mxu0 %v3487_v49  ;;  %880 = vmatpush.msra.mxu2 %v705_v52  ;;  %v260_v0 = vld [vmem:[#allocation2] sm:$0xf] }
  0x72   : > { %815 = vmatpush.msra.mxu1 %v3439_v57  ;;  %925 = vmatpush.msra.mxu3 %v3462_v63 }
  0x73   : > { %776 = vmatpush.msra.mxu0 %v3504_v28  ;;  %884 = vmatpush.msra.mxu2 %v711_v25  ;;  %v1036_v28 = vand.u32 4294901760, %v1020_v33  ;;  %v1018_v25 = vld [vmem:[%s4802_s2 + $0x8] sm:$0xff] }
  0x74   : > { %817 = vmatpush.msra.mxu1 %v3462_v63  ;;  %927 = vmatpush.msra.mxu3 %v3476_v47 }
  0x75   : > { %639 = vmatmul.f32.vlgmr.msrb.gmra.mxu2 %v638_v34  ;;  %779 = vmatpush.msra.mxu0 %v3516_v45  ;;  %v1066_v52 = vsub.f32 %v1020_v33, %v1036_v28 }
  0x76   : > { %819 = vmatpush.msra.mxu1 %v3476_v47  ;;  %888 = vmatpush.msra.mxu2 %v717_v19  ;;  %v2981_v47 = vmov 0  }
  0x77   : > { %929 = vmatpush.msra.mxu3 %v3490_v7  ;;  %2858 = vmatmul.msk.f32.vlgmr.msrb.gmra.mxu0 %vm3027_vm0, %v2979_v38 }
  0x78   : > { %2860 = vmatmul.msk.f32.vlgmr.msrb.gmra.mxu3 %vm3031_vm1, %v2979_v38  ;;  %782 = vmatpush.msra.mxu0 %v3525_v15 }
  0x79   : > { %821 = vmatpush.msra.mxu1 %v3490_v7  ;;  %892 = vmatpush.msra.mxu2 %v723_v30  ;;  %v1040_v30 = vand.u32 4294901760, %v1018_v25 }
  0x7a   : > { %931 = vmatpush.msra.mxu3 %v3496_v41  ;;  %2859 = vmatmul.msk.f32.vlgmr.msrb.gmra.mxu1 %vm3027_vm0, %v2979_v38 }
  0x7b   : > { %785 = vmatpush.msra.mxu0 %v3546_v12  ;;  %823 = vmatpush.msra.mxu1 %v3496_v41  ;;  %v1078_v23 = vsub.f32 %v1018_v25, %v1040_v30 }
  0x7c   : > { %896 = vmatpush.msra.mxu2 %v729_v61  ;;  %933 = vmatpush.msra.mxu3 %v3519_v21  ;;  %v1017_v61 = vld [vmem:[%s4802_s2] sm:$0xff] }
  0x7d   : > { %788 = vmatpush.msra.mxu0 %v3561_v62  ;;  %825 = vmatpush.msra.mxu1 %v3519_v21  ;;  %v1019_v21 = vld [vmem:[%s4802_s2 + $0x10] sm:$0xff]  ;;  %v1042_v48 = vand.u32 4294901760, %v1017_v61  ;;  %v1079_v60 = vand.u32 4294901760, %v1078_v23 }
  0x7e   : > { %900 = vmatpush.msra.mxu2 %v735_v14  ;;  %935 = vmatpush.msra.mxu3 %v3534_v17 }
  0x7f   : > { %2861 = vmatmul.msk.f32.vlgmr.msra.gmra.mxu2 %vm3031_vm1, %v2979_v38  ;;  %791 = vmatpush.msra.mxu0 %v3583_v16  ;;  %v1084_v50 = vsub.f32 %v1017_v61, %v1042_v48  ;;  %v1080_v27 = vsub.f32 %v1078_v23, %v1079_v60 }
  0x80   : > { %827 = vmatpush.msra.mxu1 %v3534_v17  ;;  %937 = vmatpush.msra.mxu3 %v3557_v24  ;;  %v1038_v17 = vand.u32 4294901760, %v1019_v21 }
  0x81   : > { %794 = vmatmul.f32.vlgmr.msra.gmra.mxu0 %v3648_v29  ;;  %2862 = vmatmul.msk.f32.vlgmr.msra.gmra.mxu3 %vm3031_vm1, %v2979_v38  ;;  %v1085_v35 = vand.u32 4294901760, %v1084_v50  ;;  %v1081_v38 = vand.u32 4294901760, %v1080_v27 }
  0x82   : > { %829 = vmatpush.msra.mxu1 %v3557_v24  ;;  %2905 = vset.pattern.permute.xlu0 %v2981_v47  ;;  %v1067_v24 = vand.u32 4294901760, %v1066_v52  ;;  %v1072_v62 = vsub.f32 %v1019_v21, %v1038_v17 }
  0x83   : > { %833 = vmatmul.f32.vlgmr.msra.gmra.mxu1 %v636_v46  ;;  %1137 = vmatpush.msrb.mxu3 %v1036_v28  ;;  %v1086_v31 = vsub.f32 %v1084_v50, %v1085_v35 }
  0x84   : > { %1037 = vmatpush.msrb.mxu0 %v1036_v28  ;;  %1108 = vmatpush.msrb.mxu2 %v1066_v52  ;;  %v1068_v14 = vsub.f32 %v1066_v52, %v1067_v24  ;;  %v1073_v20 = vand.u32 4294901760, %v1072_v62 }
  0x85   : > { %1139 = vmatpush.msrb.mxu3 %v1038_v17  ;;  %v1087_v44 = vand.u32 4294901760, %v1086_v31 }
  0x86   : > { %1039 = vmatpush.msrb.mxu0 %v1038_v17  ;;  %1111 = vmatpush.msrb.mxu2 %v1072_v62  ;;  %v1069_v6 = vand.u32 4294901760, %v1068_v14  ;;  %v1074_v26 = vsub.f32 %v1072_v62, %v1073_v20 }
  0x87   : > { %1141 = vmatpush.msrb.mxu3 %v1040_v30 }
  0x88   : > { %1041 = vmatpush.msrb.mxu0 %v1040_v30  ;;  %1114 = vmatpush.msrb.mxu2 %v1078_v23  ;;  %v1075_v1 = vand.u32 4294901760, %v1074_v26 }
  0x89   : > { %1143 = vmatpush.msrb.mxu3 %v1042_v48  ;;  %1070 = vmatpush.msrb.mxu1 %v1069_v6 }
  0x8a   : > { %1043 = vmatpush.msrb.mxu0 %v1042_v48  ;;  %1117 = vmatpush.msrb.mxu2 %v1084_v50 }
  0x8b   : > { %1076 = vmatpush.msrb.mxu1 %v1075_v1 }
  0x8c   : > { %1166 = vmatpush.msra.mxu0 %v1067_v24 }
  0x8d   : > { %1082 = vmatpush.msrb.mxu1 %v1081_v38 }
  0x8e   : > { %v952_v13 = vpop.xlane.xlu0 %951  ;;  %1170 = vmatpush.msra.mxu0 %v1073_v20 }
  0x8f   : > { %v953_v59 = vadd.f32 %v952_v13, %v946_v18  ;;  %1088 = vmatpush.msrb.mxu1 %v1087_v44 }
  0x90   : > { %1174 = vmatpush.msra.mxu0 %v1079_v60 }
  0x91   : > { %955 = vst.msk [vmem:[#allocation3] sm:$0xf] %vm257_vm4, %v953_v59  ;;  %1197 = vmatpush.msra.mxu1 %v1036_v28 }
  0x92   : > { %1178 = vmatpush.msra.mxu0 %v1085_v35 }
  0x93   : > { %1199 = vmatpush.msra.mxu1 %v1038_v17 }
  0x95   : > { %1201 = vmatpush.msra.mxu1 %v1040_v30 }
  0x97   : > { %1203 = vmatpush.msra.mxu1 %v1042_v48 }
  0x98   : > { %v995_v55 = vld [vmem:[#allocation3] sm:$0xf] }
  0x99   : > { %v996_v2 = vmax.f32 %v995_v55, 1.0 }
  0x9b   : > { %999 = vperm.xlu0 %2905, %v996_v2  }
  0xda   : > { %v299_v4 = vpop.f32.mrf.mxu0 }
  0xdc   : > { %v454_v63 = vpop.f32.mrf.mxu2 }
  0xde   : > { %v400_v57 = vpop.f32.mrf.mxu1 }
  0xdf   : > { %v401_v9 = vadd.f32 %v400_v57, %v299_v4 }
  0xe0   : > { %v493_v39 = vpop.f32.mrf.mxu3 }
  0xe1   : > { %v455_v43 = vadd.f32 %v454_v63, %v401_v9 }
  0xe3   : > { %v494_v49 = vadd.f32 %v493_v39, %v455_v43 }
  0xf4   : > { %v562_v7 = vpop.f32.mrf.mxu0 }
  0xf5   : > { %v563_v41 = vadd.f32 %v562_v7, %v494_v49 }
  0xf7   : > { %v599_v5 = vpop.f32.mrf.mxu1 }
  0xf8   : > { %v640_v45 = vpop.f32.mrf.mxu2  ;;  %v600_v15 = vadd.f32 %v599_v5, %v563_v41 }
  0xfa   : > { %v641_v12 = vadd.f32 %v640_v45, %v600_v15 }
  0xfb   : > { %v741_v19 = vpop.f32.mrf.mxu3 }
  0xfc   : > { %v742_v16 = vadd.f32 %v741_v19, %v641_v12 }
  0xfe   : > { %v795_v58 = vpop.f32.mrf.mxu0 }
  0xff   : > { %v796_v40 = vadd.f32 %v795_v58, %v742_v16 }
 0x100   : > { %v834_v37 = vpop.f32.mrf.mxu1 }
 0x101   : > { %v835_v51 = vadd.f32 %v834_v37, %v796_v40 }
 0x102   : > { %v903_v53 = vpop.f32.mrf.mxu2 }
 0x103   : > { %v904_v56 = vadd.f32 %v903_v53, %v835_v51 }
 0x104   : > { %v940_v36 = vpop.f32.mrf.mxu3 }
 0x105   : > { %v941_v32 = vadd.f32 %v940_v36, %v904_v56 }
 0x107   : > { %v943_v11 = vadd.f32 %v941_v32, %v260_v0 }
 0x109   : > { %945 = vst.msk [vmem:[#allocation2] sm:$0xf] %vm255_vm5, %v943_v11 }
 0x10d   : > { %v1000_v29 = vpop.permute.xlu0 %999 }
 0x10e   : > { %2906 = vrcp.f32 %v1000_v29  ;;  %v1013_v22 = vand.u32 2147483648, %v1000_v29  ;;  %v1011_v34 = vand.u32 2147483647, %v1000_v29  ;;  %vm1007_vm7 = vweird.f32 %v1000_v29 }
 0x110   : > { %v1014_v47 = vor.u32 1.1754944e-38, %v1013_v22  ;;  %vm1012_vm9 = vcmp.eq.f32.partialorder %v1011_v34, 8.507059e+37  ;;  %v994_v13 = vld [vmem:[#allocation2] sm:$0xf] }
 0x114   : > { %v2907_v42 = vpop.eup %2906 }
 0x115   : > { %v1003_v54 = vmul.f32 %v2907_v42, %v1000_v29  ;;  %vm1008_vm6 = vweird.f32 %v2907_v42 }
 0x116   : > { %vm1009_vm8 = vmor %vm1007_vm7, %vm1008_vm6 }
 0x117   : > { %v1004_v46 = vsub.f32 1.0, %v1003_v54 }
 0x119   : > { %v1005_v3 = vmul.f32 %v2907_v42, %v1004_v46 }
 0x11b   : > { %v1006_v10 = vadd.f32 %v2907_v42, %v1005_v3 }
 0x11d   : > { %v1010_v18 = vsel %vm1009_vm8, %v2907_v42, %v1006_v10 }
 0x11e   : > { %v1015_v59 = vsel %vm1012_vm9, %v1014_v47, %v1010_v18 }
 0x11f   : > { %v1016_v55 = vmul.f32 %v1015_v59, %v994_v13 }
 0x121   : > { %v1022_v2 = vsel %vm958_vm3, %v1016_v55, 0 }
 0x122   : > { %v1044_v57 = vand.u32 4294901760, %v1022_v2 }
 0x124   : > { %1090 = vmatmul.f32.vlgmr.msrb.gmra.mxu1 %v1044_v57  ;;  %v1045_v4 = vsub.f32 %v1022_v2, %v1044_v57 }
 0x126   : > { %1120 = vmatmul.f32.vlgmr.msrb.gmra.mxu2 %v1045_v4  ;;  %v1046_v9 = vand.u32 4294901760, %v1045_v4 }
 0x128   : > { %1147 = vmatmul.f32.vlgmr.msrb.gmra.mxu3 %v1046_v9  ;;  %v1047_v63 = vsub.f32 %v1045_v4, %v1046_v9 }
 0x12a   : > { %v1048_v43 = vand.u32 4294901760, %v1047_v63 }
 0x12c   : > { %1049 = vmatmul.f32.vlgmr.msrb.gmra.mxu0 %v1048_v43  ;;  %1205 = vmatmul.f32.vlgmr.msra.gmra.mxu1 %v1044_v57 }
 0x134   : > { %1180 = vmatmul.f32.vlgmr.msra.gmra.mxu0 %v1044_v57 }
 0x1a1   : > { %v1091_v39 = vpop.f32.mrf.mxu1 }
 0x1a9   : > { %v1050_v49 = vpop.f32.mrf.mxu0  ;;  %v1121_v41 = vpop.f32.mrf.mxu2 }
 0x1aa   : > { %v1092_v7 = vadd.f32 %v1091_v39, %v1050_v49  ;;  %v1206_v15 = vpop.f32.mrf.mxu1 }
 0x1ab   : > { %v1148_v28 = vpop.f32.mrf.mxu3 }
 0x1ac   : > { %v1122_v33 = vadd.f32 %v1121_v41, %v1092_v7 }
 0x1ae   : > { %v1149_v5 = vadd.f32 %v1148_v28, %v1122_v33 }
 0x1b1   : > { %v1181_v45 = vpop.f32.mrf.mxu0 }
 0x1b2   : > { %v1182_v21 = vadd.f32 %v1181_v45, %v1149_v5 }
 0x1b4   : > { %v1207_v52 = vadd.f32 %v1206_v15, %v1182_v21 }
 0x1b6   : > { %2908 = vtanh.f32 %v1207_v52 }
 0x1bc   : > { %v2909_v17 = vpop.eup %2908 }
 0x1bd   : > { %1210 = vst.msk [vmem:[#allocation4] sm:$0xf] %vm255_vm5, %v2909_v17 }
 0x1be PF: > { %p2863_p5 = scmp.ne.s32.totalorder %s2968_s12, 1 }
 0x1c0   : > { %1214 = sbr.rel (%p2863_p5) target bundleno = 990 (0x3de), region = 48 }
 0x1c5   : > { %v3751_v25 = vld [vmem:[#allocation5 + $0x78] sm:$0xff]  ;;  %vm1250_vm10 = vcmask 261120   ;;  %v3753_v12 = vld [vmem:[#allocation5 + $0x70] sm:$0xff]  ;;  %v3755_v19 = vld [vmem:[#allocation5 + $0x68] sm:$0xff]  ;;  %vm2034_vm11 = vcmask 1043456   ;;  %vm2773_vm4 = vcmask 257024  }
 0x1c6   : > { %v1300_v24 = vsel %vm1250_vm10, %v3751_v25, 0  ;;  %v1297_v62 = vsel %vm1250_vm10, %v3753_v12, 0  ;;  %v3761_v30 = vld [vmem:[#allocation5 + $0x60] sm:$0xff]  ;;  %v3763_v61 = vld [vmem:[#allocation5 + $0x58] sm:$0xff]  ;;  %v1294_v20 = vsel %vm1250_vm10, %v3755_v19, 0  ;;  %v3787_v60 = vld [vmem:[#allocation5 + $0x50] sm:$0xff] }
 0x1c7   : > { %v3765_v16 = vand.u32 4294901760, %v1300_v24  ;;  %v3767_v14 = vand.u32 4294901760, %v1297_v62  ;;  %v3771_v23 = vand.u32 4294901760, %v1294_v20  ;;  %v1291_v58 = vsel %vm1250_vm10, %v3761_v30, 0  ;;  %4970 = vst [vmem:[#allocation23_spill] sm:$0xff] %v3787_v60  ;;  %v3812_v0 = vld [vmem:[#allocation5 + $0x48] sm:$0xff] }
 0x1c8   : > { %v3783_v6 = vand.u32 4294901760, %v1291_v58  ;;  %v1288_v26 = vsel %vm1250_vm10, %v3763_v61, 0  ;;  %v1285_v27 = vsel %vm1250_vm10, %v3787_v60, 0  ;;  %4971 = vst [vmem:[#allocation24_spill] sm:$0xff] %v3812_v0  ;;  %v1282_v42 = vsel %vm1250_vm10, %v3812_v0, 0  ;;  %v3828_v54 = vld [vmem:[#allocation5 + $0x40] sm:$0xff] }
 0x1c9   : > { %1351 = vmatpush.xpose.msra.mxu0 %v3765_v16  ;;  %v3777_v48 = vsub.f32 %v1300_v24, %v3765_v16  ;;  %1547 = vmatpush.xpose.msra.mxu3 %v3765_v16  ;;  %v3781_v40 = vsub.f32 %v1297_v62, %v3767_v14  ;;  %v3790_v37 = vsub.f32 %v1294_v20, %v3771_v23  ;;  %v3795_v1 = vand.u32 4294901760, %v1288_v26  ;;  %v3844_v18 = vld [vmem:[#allocation5 + $0x38] sm:$0xff]  ;;  %v3860_v9 = vld [vmem:[#allocation5 + $0x30] sm:$0xff]  ;;  %v3872_v41 = vld [vmem:[#allocation5 + $0x28] sm:$0xff] }
 0x1ca   : > { %v3809_v38 = vsub.f32 %v1291_v58, %v3783_v6  ;;  %v3814_v36 = vand.u32 4294901760, %v1285_v27  ;;  %4972 = vst [vmem:[#allocation25_spill] sm:$0xff] %v3828_v54  ;;  %v3838_v10 = vand.u32 4294901760, %v1282_v42  ;;  %v1279_v47 = vsel %vm1250_vm10, %v3828_v54, 0  ;;  %v3890_v17 = vld [vmem:[#allocation5 + $0x20] sm:$0xff] }
 0x1cb   : > { %1494 = vmatpush.xpose.msra.mxu2 %v3777_v48  ;;  %v4850_v50 = vand.u32 4294901760, %v3777_v48  ;;  %v4849_v51 = vand.u32 4294901760, %v3781_v40  ;;  %v4847_v56 = vand.u32 4294901760, %v3790_v37  ;;  %v3822_v29 = vsub.f32 %v1288_v26, %v3795_v1  ;;  %4973 = vst [vmem:[#allocation26_spill] sm:$0xff] %v3844_v18 }
 0x1cc   : > { %v4846_v11 = vand.u32 4294901760, %v3809_v38  ;;  %v3831_v46 = vsub.f32 %v1285_v27, %v3814_v36  ;;  %v3852_v2 = vsub.f32 %v1282_v42, %v3838_v10  ;;  %v3854_v57 = vand.u32 4294901760, %v1279_v47  ;;  %4974 = vst [vmem:[#allocation27_spill] sm:$0xff] %v3860_v9 }
 0x1cd   : > { %1353 = vmatpush.xpose.msra.mxu0 %v3767_v14  ;;  %v1394_v53 = vsub.f32 %v3777_v48, %v4850_v50  ;;  %1549 = vmatpush.xpose.msra.mxu3 %v3767_v14  ;;  %v1400_v35 = vsub.f32 %v3781_v40, %v4849_v51  ;;  %v1406_v44 = vsub.f32 %v3790_v37, %v4847_v56  ;;  %v4845_v34 = vand.u32 4294901760, %v3822_v29 }
 0x1ce   : > { %v1412_v3 = vsub.f32 %v3809_v38, %v4846_v11  ;;  %v4844_v13 = vand.u32 4294901760, %v3831_v46  ;;  %v1276_v4 = vsel %vm1250_vm10, %v3844_v18, 0  ;;  %v4843_v39 = vand.u32 4294901760, %v3852_v2  ;;  %4975 = vst [vmem:[#allocation28_spill] sm:$0xff] %v3872_v41 }
 0x1cf   : > { %v1395_v31 = vand.u32 4294901760, %v1394_v53  ;;  %1497 = vmatpush.xpose.msra.mxu2 %v3781_v40  ;;  %v1401_v32 = vand.u32 4294901760, %v1400_v35  ;;  %v1407_v22 = vand.u32 4294901760, %v1406_v44  ;;  %v1418_v55 = vsub.f32 %v3822_v29, %v4845_v34  ;;  %4976 = vst [vmem:[#allocation29_spill] sm:$0xff] %v3890_v17  ;;  %v3908_v53 = vld [vmem:[#allocation5 + $0x18] sm:$0xff] }
 0x1d0   : > { %v1413_v59 = vand.u32 4294901760, %v1412_v3  ;;  %v1424_v63 = vsub.f32 %v3831_v46, %v4844_v13  ;;  %v3868_v49 = vsub.f32 %v1279_v47, %v3854_v57  ;;  %v3870_v7 = vand.u32 4294901760, %v1276_v4  ;;  %4977 = vst [vmem:[#allocation30_spill] sm:$0xff] %v3908_v53  ;;  %v3924_v3 = vld [vmem:[#allocation5 + $0x10] sm:$0xff] }
 0x1d1   : > { %1396 = vmatpush.xpose.msra.mxu1 %v1395_v31  ;;  %1355 = vmatpush.xpose.msra.mxu0 %v3771_v23  ;;  %v1419_v43 = vand.u32 4294901760, %v1418_v55  ;;  %v1273_v33 = vsel %vm1250_vm10, %v3860_v9, 0  ;;  %v1270_v5 = vsel %vm1250_vm10, %v3872_v41, 0  ;;  %v1430_v45 = vsub.f32 %v3852_v2, %v4843_v39  ;;  %4978 = vst [vmem:[#allocation31_spill] sm:$0xff] %v3924_v3 }
 0x1d2   : > { %1551 = vmatpush.xpose.msra.mxu3 %v3771_v23  ;;  %v1425_v28 = vand.u32 4294901760, %v1424_v63  ;;  %v4842_v21 = vand.u32 4294901760, %v3868_v49  ;;  %v3886_v15 = vsub.f32 %v1276_v4, %v3870_v7  ;;  %v3888_v52 = vand.u32 4294901760, %v1273_v33 }
 0x1d3   : > { %1500 = vmatpush.xpose.msra.mxu2 %v3790_v37  ;;  %v3894_v24 = vand.u32 4294901760, %v1270_v5  ;;  %v1267_v62 = vsel %vm1250_vm10, %v3890_v17, 0  ;;  %v1431_v20 = vand.u32 4294901760, %v1430_v45 }
 0x1d4   : > { %v1436_v58 = vsub.f32 %v3868_v49, %v4842_v21  ;;  %v4840_v26 = vand.u32 4294901760, %v3886_v15  ;;  %v3904_v27 = vsub.f32 %v1273_v33, %v3888_v52  ;;  %v3910_v35 = vand.u32 4294901760, %v1267_v62 }
 0x1d5   : > { %1402 = vmatpush.xpose.msra.mxu1 %v1401_v32  ;;  %1357 = vmatpush.xpose.msra.mxu0 %v3783_v6  ;;  %v3918_v42 = vsub.f32 %v1270_v5, %v3894_v24  ;;  %v1261_v33 = vsel %vm1250_vm10, %v3924_v3, 0  ;;  %v4041_v3 = vld [vmem:[#allocation5 + $0xd0] sm:$0xff] }
 0x1d6   : > { %1553 = vmatpush.xpose.msra.mxu3 %v3783_v6  ;;  %v1437_v31 = vand.u32 4294901760, %v1436_v58  ;;  %v1442_v32 = vsub.f32 %v3886_v15, %v4840_v26  ;;  %v4839_v44 = vand.u32 4294901760, %v3904_v27  ;;  %v3927_v47 = vsub.f32 %v1267_v62, %v3910_v35  ;;  %v3947_v62 = vld [vmem:[#allocation5 + $0xf0] sm:$0xff]  ;;  %4989 = vst [vmem:[#allocation39_spill] sm:$0xff] %v4041_v3 }
 0x1d7   : > { %1503 = vmatpush.xpose.msra.mxu2 %v3809_v38  ;;  %v4841_v4 = vand.u32 4294901760, %v3918_v42  ;;  %4981 = vst [vmem:[#allocation34_spill] sm:$0xff] %v3947_v62 }
 0x1d8   : > { %v1448_v55 = vsub.f32 %v3904_v27, %v4839_v44  ;;  %v4848_v5 = vand.u32 4294901760, %v3927_v47 }
 0x1d9   : > { %1408 = vmatpush.xpose.msra.mxu1 %v1407_v22  ;;  %1359 = vmatpush.xpose.msra.mxu0 %v3795_v1  ;;  %v1264_v22 = vsel %vm1250_vm10, %v3908_v53, 0  ;;  %v1454_v58 = vsub.f32 %v3918_v42, %v4841_v4  ;;  %v3971_v4 = vld [vmem:[#allocation5 + $0xe8] sm:$0xff] }
 0x1da   : > { %1555 = vmatpush.xpose.msra.mxu3 %v3795_v1  ;;  %v3934_v63 = vand.u32 4294901760, %v1264_v22  ;;  %4983 = vst [vmem:[#allocation36_spill] sm:$0xff] %v3971_v4 }
 0x1db   : > { %1506 = vmatpush.xpose.msra.mxu2 %v3822_v29  ;;  %v1455_v21 = vand.u32 4294901760, %v1454_v58  ;;  %v1342_v58 = vsel %vm1250_vm10, %v3971_v4, 0 }
 0x1dd   : > { %1414 = vmatpush.xpose.msra.mxu1 %v1413_v59  ;;  %1361 = vmatpush.xpose.msra.mxu0 %v3814_v36  ;;  %v1443_v59 = vand.u32 4294901760, %v1442_v32  ;;  %v3956_v32 = vand.u32 4294901760, %v1261_v33 }
 0x1de   : > { %1557 = vmatpush.xpose.msra.mxu3 %v3814_v36 }
 0x1df   : > { %1509 = vmatpush.xpose.msra.mxu2 %v3831_v46  ;;  %v3976_v13 = vsub.f32 %v1261_v33, %v3956_v32 }
 0x1e1   : > { %1420 = vmatpush.xpose.msra.mxu1 %v1419_v43  ;;  %1363 = vmatpush.xpose.msra.mxu0 %v3838_v10  ;;  %v3936_v43 = vld [vmem:[#allocation5 + $0xf8] sm:$0xff]  ;;  %v4985_v4 = vand.u32 4294901760, %v3976_v13 }
 0x1e2   : > { %1559 = vmatpush.xpose.msra.mxu3 %v3838_v10  ;;  %4979 = vst [vmem:[#allocation32_spill] sm:$0xff] %v3936_v43  ;;  %v1348_v45 = vsel %vm1250_vm10, %v3936_v43, 0 }
 0x1e3   : > { %1512 = vmatpush.xpose.msra.mxu2 %v3852_v2  ;;  %v3964_v26 = vand.u32 4294901760, %v1348_v45 }
 0x1e5   : > { %1426 = vmatpush.xpose.msra.mxu1 %v1425_v28  ;;  %1365 = vmatpush.xpose.msra.mxu0 %v3854_v57  ;;  %v3942_v28 = vld [vmem:[#allocation5 + $0x8] sm:$0xff] }
 0x1e6   : > { %1561 = vmatpush.xpose.msra.mxu3 %v3854_v57  ;;  %4980 = vst [vmem:[#allocation33_spill] sm:$0xff] %v3942_v28  ;;  %v1258_v44 = vsel %vm1250_vm10, %v3942_v28, 0  ;;  %v4056_v28 = vld [vmem:[#allocation5 + $0xc8] sm:$0xff] }
 0x1e7   : > { %1515 = vmatpush.xpose.msra.mxu2 %v3868_v49  ;;  %v3978_v34 = vand.u32 4294901760, %v1258_v44  ;;  %4991 = vst [vmem:[#allocation40_spill] sm:$0xff] %v4056_v28 }
 0x1e9   : > { %1432 = vmatpush.xpose.msra.mxu1 %v1431_v20  ;;  %1367 = vmatpush.xpose.msra.mxu0 %v3870_v7  ;;  %v1449_v20 = vand.u32 4294901760, %v1448_v55  ;;  %v1345_v55 = vsel %vm1250_vm10, %v3947_v62, 0  ;;  %v3997_v50 = vsub.f32 %v1258_v44, %v3978_v34  ;;  %v1472_v62 = vsub.f32 %v3976_v13, %v4985_v4 }
 0x1ea   : > { %1563 = vmatpush.xpose.msra.mxu3 %v3870_v7  ;;  %v3983_v56 = vand.u32 4294901760, %v1345_v55 }
 0x1eb   : > { %1518 = vmatpush.xpose.msra.mxu2 %v3886_v15 }
 0x1ed   : > { %1438 = vmatpush.xpose.msra.mxu1 %v1437_v31  ;;  %1369 = vmatpush.xpose.msra.mxu0 %v3888_v52  ;;  %v3954_v31 = vsub.f32 %v1264_v22, %v3934_v63  ;;  %v1460_v22 = vsub.f32 %v3927_v47, %v4848_v5 }
 0x1ee   : > { %1565 = vmatpush.xpose.msra.mxu3 %v3888_v52 }
 0x1ef   : > { %1521 = vmatpush.xpose.msra.mxu2 %v3904_v27  ;;  %v4853_v39 = vand.u32 4294901760, %v3954_v31  ;;  %v1461_v5 = vand.u32 4294901760, %v1460_v22  ;;  %v4005_v22 = vsub.f32 %v1345_v55, %v3983_v56  ;;  %v1473_v55 = vand.u32 4294901760, %v1472_v62 }
 0x1f1   : > { %1444 = vmatpush.xpose.msra.mxu1 %v1443_v59  ;;  %1371 = vmatpush.xpose.msra.mxu0 %v3894_v24  ;;  %v3962_v59 = vld [vmem:[#allocation5] sm:$0xff]  ;;  %v1466_v33 = vsub.f32 %v3954_v31, %v4853_v39  ;;  %v4988_v39 = vand.u32 4294901760, %v3997_v50 }
 0x1f2   : > { %1567 = vmatpush.xpose.msra.mxu3 %v3894_v24  ;;  %4982 = vst [vmem:[#allocation35_spill] sm:$0xff] %v3962_v59  ;;  %v1255_v11 = vsel %vm1250_vm10, %v3962_v59, 0  ;;  %v4021_v59 = vld [vmem:[#allocation5 + $0xd8] sm:$0xff] }
 0x1f3   : > { %1524 = vmatpush.xpose.msra.mxu2 %v3918_v42  ;;  %v3999_v8 = vand.u32 4294901760, %v1255_v11  ;;  %v1467_v44 = vand.u32 4294901760, %v1466_v33  ;;  %4986 = vst [vmem:[#allocation38_spill] sm:$0xff] %v4021_v59 }
 0x1f5   : > { %1450 = vmatpush.xpose.msra.mxu1 %v1449_v20  ;;  %1373 = vmatpush.xpose.msra.mxu0 %v3910_v35  ;;  %v3987_v20 = vsub.f32 %v1348_v45, %v3964_v26  ;;  %v4001_v45 = vld [vmem:[#allocation5 + $0xe0] sm:$0xff]  ;;  %v4019_v43 = vsub.f32 %v1255_v11, %v3999_v8  ;;  %v1336_v11 = vsel %vm1250_vm10, %v4021_v59, 0 }
 0x1f6   : > { %1569 = vmatpush.xpose.msra.mxu3 %v3910_v35  ;;  %4984 = vst [vmem:[#allocation37_spill] sm:$0xff] %v4001_v45  ;;  %v1339_v51 = vsel %vm1250_vm10, %v4001_v45, 0  ;;  %v4052_v17 = vand.u32 4294901760, %v1336_v11 }
 0x1f7   : > { %1527 = vmatpush.xpose.msra.mxu2 %v3927_v47  ;;  %v4987_v33 = vand.u32 4294901760, %v3987_v20  ;;  %v4032_v45 = vand.u32 4294901760, %v1339_v51 }
 0x1f9   : > { %1456 = vmatpush.xpose.msra.mxu1 %v1455_v21  ;;  %1375 = vmatpush.xpose.msra.mxu0 %v3934_v63  ;;  %v4007_v21 = vand.u32 4294901760, %v1342_v58  ;;  %v1735_v4 = vsub.f32 %v3987_v20, %v4987_v33  ;;  %v4990_v33 = vand.u32 4294901760, %v4005_v22  ;;  %v4050_v62 = vsub.f32 %v1339_v51, %v4032_v45 }
 0x1fa   : > { %1571 = vmatpush.xpose.msra.mxu3 %v3934_v63 }
 0x1fb   : > { %1530 = vmatpush.xpose.msra.mxu2 %v3954_v31  ;;  %v1741_v53 = vsub.f32 %v4005_v22, %v4990_v33  ;;  %v4992_v33 = vand.u32 4294901760, %v4019_v43 }
 0x1fd   : > { %1462 = vmatpush.xpose.msra.mxu1 %v1461_v5  ;;  %1377 = vmatpush.xpose.msra.mxu0 %v3956_v32  ;;  %v4026_v5 = vsub.f32 %v1342_v58, %v4007_v21  ;;  %v1478_v58 = vsub.f32 %v3997_v50, %v4988_v39  ;;  %v1333_v39 = vsel %vm1250_vm10, %v4041_v3, 0  ;;  %v1484_v59 = vsub.f32 %v4019_v43, %v4992_v33 }
 0x1fe   : > { %1573 = vmatpush.xpose.msra.mxu3 %v3956_v32  ;;  %v1742_v51 = vand.u32 4294901760, %v1741_v53  ;;  %v4073_v18 = vand.u32 4294901760, %v1333_v39  ;;  %v4078_v53 = vld [vmem:[#allocation5 + $0xc0] sm:$0xff] }
 0x1ff   : > { %1533 = vmatpush.xpose.msra.mxu2 %v3976_v13  ;;  %v1479_v41 = vand.u32 4294901760, %v1478_v58  ;;  %v4994_v9 = vand.u32 4294901760, %v4026_v5  ;;  %v4071_v58 = vsub.f32 %v1336_v11, %v4052_v17  ;;  %4995 = vst [vmem:[#allocation41_spill] sm:$0xff] %v4078_v53  ;;  %v1485_v33 = vand.u32 4294901760, %v1484_v59 }
 0x201   : > { %1468 = vmatpush.xpose.msra.mxu1 %v1467_v44  ;;  %1379 = vmatpush.xpose.msra.mxu0 %v3978_v34  ;;  %v1736_v44 = vand.u32 4294901760, %v1735_v4  ;;  %v4993_v4 = vand.u32 4294901760, %v3777_v48  ;;  %v1747_v3 = vsub.f32 %v4026_v5, %v4994_v9  ;;  %v1330_v48 = vsel %vm1250_vm10, %v4056_v28, 0 }
 0x202   : > { %1575 = vmatpush.xpose.msra.mxu3 %v3978_v34  ;;  %v4996_v9 = vand.u32 4294901760, %v3781_v40  ;;  %v4883_v54 = vand.u32 4294901760, %v4071_v58  ;;  %v4089_v28 = vsub.f32 %v1333_v39, %v4073_v18  ;;  %v4094_v40 = vld [vmem:[#allocation5 + $0xb8] sm:$0xff] }
 0x203   : > { %1536 = vmatpush.xpose.msra.mxu2 %v3997_v50  ;;  %4997 = vst [vmem:[#allocation42_spill] sm:$0xff] %v4094_v40 }
 0x205   : > { %1474 = vmatpush.xpose.msra.mxu1 %v1473_v55  ;;  %1381 = vmatpush.xpose.msra.mxu0 %v3999_v8  ;;  %v4882_v55 = vand.u32 4294901760, %v4050_v62 }
 0x206   : > { %1577 = vmatpush.xpose.msra.mxu3 %v3999_v8 }
 0x207   : > { %1539 = vmatpush.xpose.msra.mxu2 %v4019_v43  ;;  %v1753_v11 = vsub.f32 %v4050_v62, %v4882_v55  ;;  %v4884_v55 = vand.u32 4294901760, %v4089_v28 }
 0x209   : > { %1588 = vmatpush.xpose.msrb.mxu0 %v4993_v4  ;;  %1480 = vmatpush.xpose.msra.mxu1 %v1479_v41  ;;  %v4082_v4 = vand.u32 4294901760, %v1330_v48  ;;  %v1327_v41 = vsel %vm1250_vm10, %v4078_v53, 0  ;;  %v1754_v39 = vand.u32 4294901760, %v1753_v11 }
 0x20a   : > { %1737 = vmatpush.xpose.msrb.mxu3 %v1736_v44  ;;  %v1748_v44 = vand.u32 4294901760, %v1747_v3  ;;  %v4998_v3 = vand.u32 4294901760, %v3790_v37  ;;  %v5000_v37 = vand.u32 4294901760, %v3809_v38  ;;  %v4128_v38 = vld [vmem:[#allocation5 + $0xa8] sm:$0xff] }
 0x20b   : > { %1692 = vmatpush.xpose.msrb.mxu2 %v3964_v26  ;;  %v4100_v59 = vsub.f32 %v1330_v48, %v4082_v4  ;;  %5001 = vst [vmem:[#allocation44_spill] sm:$0xff] %v4128_v38 }
 0x20d   : > { %1592 = vmatpush.xpose.msrb.mxu0 %v4996_v9  ;;  %1486 = vmatpush.xpose.msra.mxu1 %v1485_v33  ;;  %v1759_v9 = vsub.f32 %v4071_v58, %v4883_v54  ;;  %v1324_v33 = vsel %vm1250_vm10, %v4094_v40, 0  ;;  %v4889_v48 = vand.u32 4294901760, %v4100_v59  ;;  %v1765_v54 = vsub.f32 %v4089_v28, %v4884_v55 }
 0x20e   : > { %1743 = vmatpush.xpose.msrb.mxu3 %v1742_v51  ;;  %v4102_v51 = vand.u32 4294901760, %v1327_v41  ;;  %v4120_v11 = vand.u32 4294901760, %v1324_v33 }
 0x20f   : > { %1694 = vmatpush.xpose.msrb.mxu2 %v3983_v56  ;;  %v1766_v55 = vand.u32 4294901760, %v1765_v54 }
 0x211   : > { %1655 = vmatpush.xpose.msrb.mxu1 %v3765_v16  ;;  %1596 = vmatpush.xpose.msrb.mxu0 %v4998_v3  ;;  %v4111_v16 = vld [vmem:[#allocation5 + $0xb0] sm:$0xff]  ;;  %v1760_v3 = vand.u32 4294901760, %v1759_v9 }
 0x212   : > { %1749 = vmatpush.xpose.msrb.mxu3 %v1748_v44  ;;  %4999 = vst [vmem:[#allocation43_spill] sm:$0xff] %v4111_v16  ;;  %v4118_v44 = vsub.f32 %v1327_v41, %v4102_v51  ;;  %v5002_v41 = vand.u32 4294901760, %v3822_v29  ;;  %v4145_v29 = vld [vmem:[#allocation5 + $0xa0] sm:$0xff] }
 0x213   : > { %1696 = vmatpush.xpose.msrb.mxu2 %v4007_v21  ;;  %5003 = vst [vmem:[#allocation45_spill] sm:$0xff] %v4145_v29 }
 0x214   : > { %v4896_v9 = vand.u32 4294901760, %v4118_v44 }
 0x215   : > { %1657 = vmatpush.xpose.msrb.mxu1 %v3767_v14  ;;  %1600 = vmatpush.xpose.msrb.mxu0 %v5000_v37  ;;  %v1321_v14 = vsel %vm1250_vm10, %v4111_v16, 0  ;;  %v4138_v37 = vsub.f32 %v1324_v33, %v4120_v11  ;;  %v1249_v16 = vld [vmem:[#allocation4] sm:$0xf]  ;;  %v5004_v33 = vand.u32 4294901760, %v3831_v46 }
 0x216   : > { %1755 = vmatpush.xpose.msrb.mxu3 %v1754_v39  ;;  %v1771_v39 = vsub.f32 %v4100_v59, %v4889_v48  ;;  %v4140_v40 = vand.u32 4294901760, %v1321_v14  ;;  %v4169_v46 = vld [vmem:[#allocation5 + $0x98] sm:$0xff] }
 0x217   : > { %1698 = vmatpush.xpose.msrb.mxu2 %v4032_v45  ;;  %v4901_v53 = vand.u32 4294901760, %v4138_v37  ;;  %5005 = vst [vmem:[#allocation46_spill] sm:$0xff] %v4169_v46 }
 0x218   : > { %v1772_v54 = vand.u32 4294901760, %v1771_v39 }
 0x219   : > { %1659 = vmatpush.xpose.msrb.mxu1 %v3771_v23  ;;  %1604 = vmatpush.xpose.msrb.mxu0 %v5002_v41  ;;  %v1318_v23 = vsel %vm1250_vm10, %v4128_v38, 0  ;;  %v1252_v41 = vsel %vm1250_vm10, %v1249_v16, 0  ;;  %v4158_v38 = vsub.f32 %v1321_v14, %v4140_v40  ;;  %v1315_v16 = vsel %vm1250_vm10, %v4145_v29, 0 }
 0x21a   : > { %1761 = vmatpush.xpose.msrb.mxu3 %v1760_v3  ;;  %v4148_v48 = vand.u32 4294901760, %v1252_v41  ;;  %v1777_v3 = vsub.f32 %v4118_v44, %v4896_v9  ;;  %v4160_v0 = vand.u32 4294901760, %v1318_v23  ;;  %v5007_v14 = vand.u32 4294901760, %v3852_v2  ;;  %v4193_v2 = vld [vmem:[#allocation5 + $0x90] sm:$0xff] }
 0x21b   : > { %1700 = vmatpush.xpose.msrb.mxu2 %v4052_v17  ;;  %v4905_v9 = vand.u32 4294901760, %v4158_v38  ;;  %5008 = vst [vmem:[#allocation48_spill] sm:$0xff] %v4193_v2 }
 0x21c   : > { %1488 = vmatmul.f32.vlgmr.msra.gmra.mxu1 %v4148_v48  ;;  %v1778_v39 = vand.u32 4294901760, %v1777_v3  ;;  %v4185_v29 = vsub.f32 %v1318_v23, %v4160_v0  ;;  %v5009_v3 = vand.u32 4294901760, %v3868_v49  ;;  %v5010_v49 = vand.u32 4294901760, %v3886_v15  ;;  %v4230_v15 = vld [vmem:[#allocation5 + $0x80] sm:$0xff] }
 0x21d   : > { %1661 = vmatpush.xpose.msrb.mxu1 %v3783_v6  ;;  %1608 = vmatpush.xpose.msrb.mxu0 %v5004_v33  ;;  %v4165_v6 = vsub.f32 %v1252_v41, %v4148_v48  ;;  %v4178_v33 = vand.u32 4294901760, %v1315_v16  ;;  %v1783_v41 = vsub.f32 %v4138_v37, %v4901_v53  ;;  %v1789_v53 = vsub.f32 %v4158_v38, %v4905_v9 }
 0x21e   : > { %1767 = vmatpush.xpose.msrb.mxu3 %v1766_v55 }
 0x21f   : > { %1702 = vmatpush.xpose.msrb.mxu2 %v4073_v18  ;;  %v4173_v55 = vand.u32 4294901760, %v4165_v6  ;;  %v4201_v23 = vsub.f32 %v1315_v16, %v4178_v33 }
 0x220   : > { %1542 = vmatmul.f32.vlgmr.msra.gmra.mxu2 %v4165_v6 }
 0x221   : > { %5006 = vst [vmem:[#allocation47_spill] sm:$0xff] %v4173_v55  ;;  %1663 = vmatpush.xpose.msrb.mxu1 %v3795_v1  ;;  %1612 = vmatpush.xpose.msrb.mxu0 %v5007_v14  ;;  %v1385_v60 = vsub.f32 %v4165_v6, %v4173_v55  ;;  %v1312_v1 = vsel %vm1250_vm10, %v4169_v46, 0  ;;  %v1784_v14 = vand.u32 4294901760, %v1783_v41  ;;  %v4906_v46 = vand.u32 4294901760, %v4185_v29 }
 0x222   : > { %1773 = vmatpush.xpose.msrb.mxu3 %v1772_v54  ;;  %v4909_v16 = vand.u32 4294901760, %v4201_v23 }
 0x223   : > { %1704 = vmatpush.xpose.msrb.mxu2 %v4082_v4  ;;  %1581 = vmatmul.f32.vlgmr.msra.gmra.mxu3 %v4173_v55  ;;  %v4195_v54 = vand.u32 4294901760, %v1385_v60  ;;  %v4207_v55 = vand.u32 4294901760, %v1312_v1  ;;  %v1309_v60 = vsel %vm1250_vm10, %v4193_v2, 0  ;;  %v1795_v41 = vsub.f32 %v4185_v29, %v4906_v46 }
 0x224   : > { %v4225_v9 = vand.u32 4294901760, %v1309_v60 }
 0x225   : > { %1665 = vmatpush.xpose.msrb.mxu1 %v3814_v36  ;;  %1616 = vmatpush.xpose.msrb.mxu0 %v5009_v3  ;;  %v4213_v36 = vld [vmem:[#allocation5 + $0x88] sm:$0xff]  ;;  %v4223_v3 = vsub.f32 %v1312_v1, %v4207_v55  ;;  %v1796_v1 = vand.u32 4294901760, %v1795_v41 }
 0x226   : > { %1779 = vmatpush.xpose.msrb.mxu3 %v1778_v39  ;;  %1387 = vmatmul.f32.vlgmr.msra.gmra.mxu0 %v4195_v54  ;;  %v1790_v39 = vand.u32 4294901760, %v1789_v53  ;;  %v5011_v53 = vand.u32 4294901760, %v3904_v27  ;;  %v4240_v46 = vsub.f32 %v1309_v60, %v4225_v9  ;;  %v5012_v27 = vand.u32 4294901760, %v3918_v42 }
 0x227   : > { %1706 = vmatpush.xpose.msrb.mxu2 %v4102_v51 }
 0x228   : > { %v1812_v60 = vand.u32 4294901760, %v4240_v46 }
 0x229   : > { %1667 = vmatpush.xpose.msrb.mxu1 %v3838_v10  ;;  %1620 = vmatpush.xpose.msrb.mxu0 %v5010_v49  ;;  %v1306_v10 = vsel %vm1250_vm10, %v4213_v36, 0  ;;  %v1806_v49 = vand.u32 4294901760, %v4223_v3 }
 0x22a   : > { %1785 = vmatpush.xpose.msrb.mxu3 %v1784_v14  ;;  %v1801_v14 = vsub.f32 %v4201_v23, %v4909_v16  ;;  %v4242_v2 = vand.u32 4294901760, %v1306_v10 }
 0x22b   : > { %1708 = vmatpush.xpose.msrb.mxu2 %v4120_v11 }
 0x22c   : > { %v4255_v41 = vsub.f32 %v1306_v10, %v4242_v2 }
 0x22d   : > { %1669 = vmatpush.xpose.msrb.mxu1 %v3854_v57  ;;  %1624 = vmatpush.xpose.msrb.mxu0 %v5011_v53  ;;  %v1303_v57 = vsel %vm1250_vm10, %v4230_v15, 0  ;;  %v1802_v53 = vand.u32 4294901760, %v1801_v14  ;;  %v1813_v14 = vsub.f32 %v4240_v46, %v1812_v60 }
 0x22e   : > { %1791 = vmatpush.xpose.msrb.mxu3 %v1790_v39  ;;  %v1807_v39 = vsub.f32 %v4223_v3, %v1806_v49  ;;  %v4257_v16 = vand.u32 4294901760, %v1303_v57 }
 0x22f   : > { %1710 = vmatpush.xpose.msrb.mxu2 %v4140_v40 }
 0x230   : > { %v1808_v42 = vand.u32 4294901760, %v1807_v39  ;;  %v4268_v10 = vsub.f32 %v1303_v57, %v4257_v16  ;;  %v5015_v57 = vand.u32 4294901760, %v3976_v13  ;;  %v5016_v39 = vand.u32 4294901760, %v3997_v50 }
 0x231   : > { %1671 = vmatpush.xpose.msrb.mxu1 %v3870_v7  ;;  %1628 = vmatpush.xpose.msrb.mxu0 %v5012_v27  ;;  %v5013_v7 = vand.u32 4294901760, %v3927_v47  ;;  %v1814_v47 = vand.u32 4294901760, %v1813_v14  ;;  %v5017_v13 = vand.u32 4294901760, %v4019_v43  ;;  %v5019_v50 = vand.u32 4294901760, %v4005_v22 }
 0x232   : > { %1797 = vmatpush.xpose.msrb.mxu3 %v1796_v1  ;;  %v1818_v1 = vand.u32 4294901760, %v4255_v41  ;;  %v5025_v43 = vand.u32 4294901760, %v4118_v44 }
 0x233   : > { %1712 = vmatpush.xpose.msrb.mxu2 %v4160_v0 }
 0x234   : > { %v1819_v27 = vsub.f32 %v4255_v41, %v1818_v1 }
 0x235   : > { %1673 = vmatpush.xpose.msrb.mxu1 %v3888_v52  ;;  %1632 = vmatpush.xpose.msrb.mxu0 %v5013_v7  ;;  %v5014_v52 = vand.u32 4294901760, %v3954_v31 }
 0x236   : > { %1803 = vmatpush.xpose.msrb.mxu3 %v1802_v53  ;;  %v1824_v53 = vand.u32 4294901760, %v4268_v10 }
 0x237   : > { %1714 = vmatpush.xpose.msrb.mxu2 %v4178_v33 }
 0x238   : > { %v1825_v31 = vsub.f32 %v4268_v10, %v1824_v53 }
 0x239   : > { %1675 = vmatpush.xpose.msrb.mxu1 %v3894_v24  ;;  %1636 = vmatpush.xpose.msrb.mxu0 %v5014_v52  ;;  %v1820_v24 = vand.u32 4294901760, %v1819_v27 }
 0x23a   : > { %1809 = vmatpush.xpose.msrb.mxu3 %v1808_v42  ;;  %v1826_v7 = vand.u32 4294901760, %v1825_v31 }
 0x23b   : > { %1716 = vmatpush.xpose.msrb.mxu2 %v4207_v55 }
 0x23d   : > { %1677 = vmatpush.xpose.msrb.mxu1 %v3910_v35  ;;  %1640 = vmatpush.xpose.msrb.mxu0 %v5015_v57  ;;  %v5018_v35 = vand.u32 4294901760, %v3987_v20 }
 0x23e   : > { %1815 = vmatpush.xpose.msrb.mxu3 %v1814_v47 }
 0x23f   : > { %1718 = vmatpush.xpose.msrb.mxu2 %v4225_v9 }
 0x241   : > { %1679 = vmatpush.xpose.msrb.mxu1 %v3934_v63  ;;  %1644 = vmatpush.xpose.msrb.mxu0 %v5016_v39  ;;  %v5021_v63 = vand.u32 4294901760, %v4050_v62 }
 0x242   : > { %1821 = vmatpush.xpose.msrb.mxu3 %v1820_v24 }
 0x243   : > { %1720 = vmatpush.xpose.msrb.mxu2 %v4242_v2 }
 0x245   : > { %1681 = vmatpush.xpose.msrb.mxu1 %v3956_v32  ;;  %1648 = vmatpush.xpose.msrb.mxu0 %v5017_v13  ;;  %v5029_v32 = vand.u32 4294901760, %v4201_v23 }
 0x246   : > { %1827 = vmatpush.xpose.msrb.mxu3 %v1826_v7 }
 0x247   : > { %1722 = vmatpush.xpose.msrb.mxu2 %v4257_v16 }
 0x248   : > { %1650 = vmatmul.f32.vlgmr.msrb.gmra.mxu0 %v4148_v48 }
 0x249   : > { %1835 = vmatpush.xpose.msra.mxu0 %v3987_v20  ;;  %1683 = vmatpush.xpose.msrb.mxu1 %v3978_v34  ;;  %v5020_v34 = vand.u32 4294901760, %v4026_v5  ;;  %v4384_v20 = vand.u32 4294901760, %v3753_v12 }
 0x24a   : > { %1996 = vmatpush.xpose.msra.mxu3 %v3964_v26  ;;  %1728 = vmatmul.f32.vlgmr.msrb.gmra.mxu2 %v4195_v54 }
 0x24b   : > { %1929 = vmatpush.xpose.msra.mxu2 %v5018_v35  ;;  %1829 = vmatmul.f32.vlgmr.msrb.gmra.mxu3 %v4148_v48  ;;  %v2138_v42 = vsub.f32 %v3753_v12, %v4384_v20 }
 0x24d   : > { %1838 = vmatpush.xpose.msra.mxu0 %v4005_v22  ;;  %1685 = vmatpush.xpose.msrb.mxu1 %v3999_v8  ;;  %v5022_v8 = vand.u32 4294901760, %v4071_v58  ;;  %v2139_v14 = vand.u32 4294901760, %v2138_v42 }
 0x24e   : > { %1998 = vmatpush.xpose.msra.mxu3 %v3983_v56 }
 0x24f   : > { %1933 = vmatpush.xpose.msra.mxu2 %v5019_v50 }
 0x250   : > { %1687 = vmatmul.f32.vlgmr.msrb.gmra.mxu1 %v4148_v48 }
 0x251   : > { %1888 = vmatpush.xpose.msra.mxu1 %v3964_v26  ;;  %1841 = vmatpush.xpose.msra.mxu0 %v4026_v5  ;;  %v5024_v26 = vand.u32 4294901760, %v4100_v59 }
 0x252   : > { %2000 = vmatpush.xpose.msra.mxu3 %v4007_v21 }
 0x253   : > { %1937 = vmatpush.xpose.msra.mxu2 %v5020_v34 }
 0x255   : > { %1890 = vmatpush.xpose.msra.mxu1 %v3983_v56  ;;  %1844 = vmatpush.xpose.msra.mxu0 %v4050_v62  ;;  %v5023_v56 = vand.u32 4294901760, %v4089_v28  ;;  %v4403_v62 = vand.u32 4294901760, %v3763_v61 }
 0x256   : > { %2002 = vmatpush.xpose.msra.mxu3 %v4032_v45 }
 0x257   : > { %1941 = vmatpush.xpose.msra.mxu2 %v5021_v63  ;;  %v2156_v57 = vsub.f32 %v3763_v61, %v4403_v62 }
 0x259   : > { %1892 = vmatpush.xpose.msra.mxu1 %v4007_v21  ;;  %1847 = vmatpush.xpose.msra.mxu0 %v4071_v58  ;;  %v4398_v21 = vand.u32 4294901760, %v3761_v30  ;;  %v2157_v31 = vand.u32 4294901760, %v2156_v57 }
 0x25a   : > { %2004 = vmatpush.xpose.msra.mxu3 %v4052_v17 }
 0x25b   : > { %1945 = vmatpush.xpose.msra.mxu2 %v5022_v8  ;;  %v2150_v47 = vsub.f32 %v3761_v30, %v4398_v21  ;;  %v2158_v7 = vsub.f32 %v2156_v57, %v2157_v31 }
 0x25d   : > { %1894 = vmatpush.xpose.msra.mxu1 %v4032_v45  ;;  %1850 = vmatpush.xpose.msra.mxu0 %v4089_v28  ;;  %v5028_v28 = vand.u32 4294901760, %v4185_v29  ;;  %v4390_v45 = vand.u32 4294901760, %v3755_v19  ;;  %v2159_v61 = vand.u32 4294901760, %v2158_v7 }
 0x25e   : > { %2006 = vmatpush.xpose.msra.mxu3 %v4073_v18 }
 0x25f   : > { %1949 = vmatpush.xpose.msra.mxu2 %v5023_v56 }
 0x261   : > { %1896 = vmatpush.xpose.msra.mxu1 %v4052_v17  ;;  %1853 = vmatpush.xpose.msra.mxu0 %v4100_v59  ;;  %v5026_v17 = vand.u32 4294901760, %v4138_v37 }
 0x262   : > { %2008 = vmatpush.xpose.msra.mxu3 %v4082_v4 }
 0x263   : > { %1953 = vmatpush.xpose.msra.mxu2 %v5024_v26 }
 0x265   : > { %1898 = vmatpush.xpose.msra.mxu1 %v4073_v18  ;;  %1856 = vmatpush.xpose.msra.mxu0 %v4118_v44  ;;  %v5027_v18 = vand.u32 4294901760, %v4158_v38  ;;  %v5033_v44 = vld [vmem:[#allocation25_spill] sm:$0xff] }
 0x266   : > { %2010 = vmatpush.xpose.msra.mxu3 %v4102_v51 }
 0x267   : > { %1957 = vmatpush.xpose.msra.mxu2 %v5025_v43 }
 0x269   : > { %1900 = vmatpush.xpose.msra.mxu1 %v4082_v4  ;;  %1859 = vmatpush.xpose.msra.mxu0 %v4138_v37  ;;  %v5035_v37 = vld [vmem:[#allocation27_spill] sm:$0xff] }
 0x26a   : > { %2012 = vmatpush.xpose.msra.mxu3 %v4120_v11 }
 0x26b   : > { %1961 = vmatpush.xpose.msra.mxu2 %v5026_v17 }
 0x26d   : > { %1902 = vmatpush.xpose.msra.mxu1 %v4102_v51  ;;  %1862 = vmatpush.xpose.msra.mxu0 %v4158_v38  ;;  %v5032_v51 = vld [vmem:[#allocation24_spill] sm:$0xff]  ;;  %v5034_v38 = vld [vmem:[#allocation26_spill] sm:$0xff] }
 0x26e   : > { %2014 = vmatpush.xpose.msra.mxu3 %v4140_v40 }
 0x26f   : > { %1965 = vmatpush.xpose.msra.mxu2 %v5027_v18 }
 0x271   : > { %1904 = vmatpush.xpose.msra.mxu1 %v4120_v11  ;;  %1865 = vmatpush.xpose.msra.mxu0 %v4185_v29  ;;  %v4419_v11 = vand.u32 4294901760, %v5033_v44  ;;  %v4429_v29 = vand.u32 4294901760, %v5035_v37 }
 0x272   : > { %2016 = vmatpush.xpose.msra.mxu3 %v4160_v0 }
 0x273   : > { %1969 = vmatpush.xpose.msra.mxu2 %v5028_v28  ;;  %v2174_v63 = vsub.f32 %v5033_v44, %v4419_v11 }
 0x275   : > { %1906 = vmatpush.xpose.msra.mxu1 %v4140_v40  ;;  %1868 = vmatpush.xpose.msra.mxu0 %v4201_v23  ;;  %v5031_v40 = vld [vmem:[#allocation47_spill] sm:$0xff]  ;;  %v2175_v26 = vand.u32 4294901760, %v2174_v63 }
 0x276   : > { %2018 = vmatpush.xpose.msra.mxu3 %v4178_v33  ;;  %v5039_v23 = vld [vmem:[#allocation31_spill] sm:$0xff] }
 0x277   : > { %1973 = vmatpush.xpose.msra.mxu2 %v5029_v32  ;;  %v2176_v18 = vsub.f32 %v2174_v63, %v2175_v26  ;;  %v2186_v32 = vsub.f32 %v5035_v37, %v4429_v29 }
 0x279   : > { %1908 = vmatpush.xpose.msra.mxu1 %v4160_v0  ;;  %1871 = vmatpush.xpose.msra.mxu0 %v4223_v3  ;;  %v4374_v0 = vand.u32 4294901760, %v3751_v25  ;;  %v5040_v3 = vld [vmem:[#allocation33_spill] sm:$0xff] }
 0x27a   : > { %2020 = vmatpush.xpose.msra.mxu3 %v4207_v55 }
 0x27b   : > { %1977 = vmatpush.xpose.msra.mxu2 %v1806_v49  ;;  %v2132_v22 = vsub.f32 %v3751_v25, %v4374_v0  ;;  %v5030_v25 = vld [vmem:[#allocation23_spill] sm:$0xff]  ;;  %v4454_v49 = vand.u32 4294901760, %v5040_v3 }
 0x27c   : > { %v4408_v4 = vand.u32 4294901760, %v5030_v25 }
 0x27d   : > { %1910 = vmatpush.xpose.msra.mxu1 %v4178_v33  ;;  %1874 = vmatpush.xpose.msra.mxu0 %v4240_v46  ;;  %v2133_v5 = vand.u32 4294901760, %v2132_v22 }
 0x27e   : > { %2022 = vmatpush.xpose.msra.mxu3 %v4225_v9  ;;  %v2162_v39 = vsub.f32 %v5030_v25, %v4408_v4 }
 0x27f   : > { %1981 = vmatpush.xpose.msra.mxu2 %v1812_v60  ;;  %v2134_v58 = vsub.f32 %v2132_v22, %v2133_v5  ;;  %v5041_v60 = vld [vmem:[#allocation35_spill] sm:$0xff] }
 0x280   : > { %v2163_v13 = vand.u32 4294901760, %v2162_v39 }
 0x281   : > { %1912 = vmatpush.xpose.msra.mxu1 %v4207_v55  ;;  %1877 = vmatpush.xpose.msra.mxu0 %v4255_v41  ;;  %v2135_v59 = vand.u32 4294901760, %v2134_v58  ;;  %v5037_v55 = vld [vmem:[#allocation29_spill] sm:$0xff]  ;;  %v4459_v41 = vand.u32 4294901760, %v5041_v60  ;;  %v2187_v58 = vand.u32 4294901760, %v2186_v32 }
 0x282   : > { %2024 = vmatpush.xpose.msra.mxu3 %v4242_v2  ;;  %v4439_v33 = vand.u32 4294901760, %v5037_v55  ;;  %v2164_v50 = vsub.f32 %v2162_v39, %v2163_v13 }
 0x283   : > { %1985 = vmatpush.xpose.msra.mxu2 %v1818_v1  ;;  %v2144_v1 = vsub.f32 %v3755_v19, %v4390_v45 }
 0x284   : > { %v2165_v8 = vand.u32 4294901760, %v2164_v50  ;;  %v2198_v44 = vsub.f32 %v5037_v55, %v4439_v33 }
 0x285   : > { %1914 = vmatpush.xpose.msra.mxu1 %v4225_v9  ;;  %1880 = vmatpush.xpose.msra.mxu0 %v4268_v10  ;;  %v4424_v9 = vand.u32 4294901760, %v5034_v38  ;;  %v2140_v10 = vsub.f32 %v2138_v42, %v2139_v14  ;;  %v2145_v52 = vand.u32 4294901760, %v2144_v1 }
 0x286   : > { %2026 = vmatpush.xpose.msra.mxu3 %v4257_v16 }
 0x287   : > { %1989 = vmatpush.xpose.msra.mxu2 %v1824_v53  ;;  %v2141_v12 = vand.u32 4294901760, %v2140_v10  ;;  %v2146_v27 = vsub.f32 %v2144_v1, %v2145_v52  ;;  %v2151_v53 = vand.u32 4294901760, %v2150_v47  ;;  %v2180_v43 = vsub.f32 %v5034_v38, %v4424_v9 }
 0x288   : > { %1883 = vmatmul.f32.vlgmr.msra.gmra.mxu0 %v4165_v6  ;;  %v5036_v6 = vld [vmem:[#allocation28_spill] sm:$0xff] }
 0x289   : > { %2091 = vmatpush.msrb.mxu0 %v4374_v0  ;;  %1916 = vmatpush.xpose.msra.mxu1 %v4242_v2  ;;  %v4434_v46 = vand.u32 4294901760, %v5036_v6  ;;  %v5038_v2 = vld [vmem:[#allocation30_spill] sm:$0xff]  ;;  %v2147_v19 = vand.u32 4294901760, %v2146_v27  ;;  %v2152_v24 = vsub.f32 %v2150_v47, %v2151_v53  ;;  %v2181_v28 = vand.u32 4294901760, %v2180_v43 }
 0x28a   : > { %2287 = vmatpush.msrb.mxu3 %v4374_v0  ;;  %1991 = vmatmul.f32.vlgmr.msra.gmra.mxu2 %v4148_v48  ;;  %v4444_v54 = vand.u32 4294901760, %v5038_v2 }
 0x28b   : > { %2028 = vmatmul.f32.vlgmr.msra.gmra.mxu3 %v4148_v48  ;;  %2093 = vmatpush.msrb.mxu0 %v4384_v20  ;;  %v4414_v48 = vand.u32 4294901760, %v5032_v51  ;;  %v2153_v30 = vand.u32 4294901760, %v2152_v24  ;;  %v2192_v25 = vsub.f32 %v5036_v6, %v4434_v46 }
 0x28c   : > { %2289 = vmatpush.msrb.mxu3 %v4384_v20  ;;  %2234 = vmatpush.msrb.mxu2 %v2132_v22  ;;  %v2177_v22 = vand.u32 4294901760, %v2176_v18 }
 0x28d   : > { %2095 = vmatpush.msrb.mxu0 %v4390_v45  ;;  %1918 = vmatpush.xpose.msra.mxu1 %v4257_v16  ;;  %v4449_v16 = vand.u32 4294901760, %v5039_v23  ;;  %v2168_v35 = vsub.f32 %v5032_v51, %v4414_v48  ;;  %v2193_v51 = vand.u32 4294901760, %v2192_v25 }
 0x28e   : > { %2291 = vmatpush.msrb.mxu3 %v4390_v45  ;;  %2237 = vmatpush.msrb.mxu2 %v2138_v42  ;;  %v2199_v42 = vand.u32 4294901760, %v2198_v44 }
 0x28f   : > { %2097 = vmatpush.msrb.mxu0 %v4398_v21  ;;  %v2169_v34 = vand.u32 4294901760, %v2168_v35  ;;  %v2194_v37 = vsub.f32 %v2192_v25, %v2193_v51 }
 0x290   : > { %1922 = vmatmul.f32.vlgmr.msra.gmra.mxu1 %v5031_v40  ;;  %2293 = vmatpush.msrb.mxu3 %v4398_v21  ;;  %v2200_v10 = vsub.f32 %v2198_v44, %v2199_v42 }
 0x291   : > { %2099 = vmatpush.msrb.mxu0 %v4403_v62  ;;  %2136 = vmatpush.msrb.mxu1 %v2135_v59  ;;  %v2170_v56 = vsub.f32 %v2168_v35, %v2169_v34  ;;  %v2188_v59 = vsub.f32 %v2186_v32, %v2187_v58 }
 0x292   : > { %2295 = vmatpush.msrb.mxu3 %v4403_v62  ;;  %2240 = vmatpush.msrb.mxu2 %v2144_v1  ;;  %v2195_v1 = vand.u32 4294901760, %v2194_v37 }
 0x293   : > { %2101 = vmatpush.msrb.mxu0 %v4408_v4  ;;  %2142 = vmatpush.msrb.mxu1 %v2141_v12  ;;  %v2171_v17 = vand.u32 4294901760, %v2170_v56  ;;  %v2189_v38 = vand.u32 4294901760, %v2188_v59  ;;  %v2201_v12 = vand.u32 4294901760, %v2200_v10  ;;  %v5044_v56 = vld [vmem:[#allocation36_spill] sm:$0xff] }
 0x294   : > { %2297 = vmatpush.msrb.mxu3 %v4408_v4  ;;  %2243 = vmatpush.msrb.mxu2 %v2150_v47  ;;  %v2210_v47 = vsub.f32 %v5039_v23, %v4449_v16  ;;  %v2222_v23 = vsub.f32 %v5041_v60, %v4459_v41  ;;  %v5048_v59 = vld [vmem:[#allocation40_spill] sm:$0xff] }
 0x295   : > { %2103 = vmatpush.msrb.mxu0 %v4414_v48  ;;  %2148 = vmatpush.msrb.mxu1 %v2147_v19 }
 0x296   : > { %2299 = vmatpush.msrb.mxu3 %v4414_v48  ;;  %2246 = vmatpush.msrb.mxu2 %v2156_v57 }
 0x297   : > { %2105 = vmatpush.msrb.mxu0 %v4419_v11  ;;  %2154 = vmatpush.msrb.mxu1 %v2153_v30  ;;  %v5042_v30 = vld [vmem:[#allocation32_spill] sm:$0xff] }
 0x298   : > { %2301 = vmatpush.msrb.mxu3 %v4419_v11  ;;  %2249 = vmatpush.msrb.mxu2 %v2162_v39  ;;  %v4497_v7 = vand.u32 4294901760, %v5042_v30  ;;  %v2920_v30 = vld [vmem:[#allocation5 + $0xe8] sm:$0xff] }
 0x299   : > { %2107 = vmatpush.msrb.mxu0 %v4424_v9  ;;  %2160 = vmatpush.msrb.mxu1 %v2159_v61  ;;  %v1489_v6 = vpop.f32.mrf.mxu1  ;;  %v5043_v61 = vld [vmem:[#allocation34_spill] sm:$0xff] }
 0x29a   : > { %2303 = vmatpush.msrb.mxu3 %v4424_v9  ;;  %2252 = vmatpush.msrb.mxu2 %v2168_v35  ;;  %v4500_v50 = vand.u32 4294901760, %v5043_v61 }
 0x29b   : > { %2109 = vmatpush.msrb.mxu0 %v4429_v29  ;;  %2166 = vmatpush.msrb.mxu1 %v2165_v8 }
 0x29c   : > { %2305 = vmatpush.msrb.mxu3 %v4429_v29  ;;  %2255 = vmatpush.msrb.mxu2 %v2174_v63 }
 0x29d   : > { %2111 = vmatpush.msrb.mxu0 %v4434_v46  ;;  %2172 = vmatpush.msrb.mxu1 %v2171_v17  ;;  %v5045_v17 = vld [vmem:[#allocation37_spill] sm:$0xff] }
 0x29e   : > { %2307 = vmatpush.msrb.mxu3 %v4434_v46  ;;  %2258 = vmatpush.msrb.mxu2 %v2180_v43  ;;  %v4508_v18 = vand.u32 4294901760, %v5045_v17 }
 0x29f   : > { %2113 = vmatpush.msrb.mxu0 %v4439_v33  ;;  %2178 = vmatpush.msrb.mxu1 %v2177_v22  ;;  %v5046_v22 = vld [vmem:[#allocation38_spill] sm:$0xff] }
 0x2a0   : > { %2309 = vmatpush.msrb.mxu3 %v4439_v33  ;;  %2261 = vmatpush.msrb.mxu2 %v2186_v32 }
 0x2a1   : > { %2115 = vmatpush.msrb.mxu0 %v4444_v54 }
 0x2a2   : > { %2311 = vmatpush.msrb.mxu3 %v4444_v54  ;;  %2264 = vmatpush.msrb.mxu2 %v2192_v25 }
 0x2a3   : > { %2117 = vmatpush.msrb.mxu0 %v4449_v16  ;;  %v1388_v55 = vpop.f32.mrf.mxu0  ;;  %v1543_v19 = vpop.f32.mrf.mxu2 }
 0x2a4   : > { %2313 = vmatpush.msrb.mxu3 %v4449_v16  ;;  %2267 = vmatpush.msrb.mxu2 %v2198_v44  ;;  %v1490_v57 = vadd.f32 %v1489_v6, %v1388_v55  ;;  %v5054_v55 = vld [vmem:[#allocation45_spill] sm:$0xff] }
 0x2a5   : > { %2119 = vmatpush.msrb.mxu0 %v4454_v49 }
 0x2a6   : > { %2315 = vmatpush.msrb.mxu3 %v4454_v49  ;;  %v1582_v63 = vpop.f32.mrf.mxu3 }
 0x2a7   : > { %2121 = vmatpush.msrb.mxu0 %v4459_v41 }
 0x2a8   : > { %2317 = vmatpush.msrb.mxu3 %v4459_v41 }
 0x2a9   : > { %2328 = vmatpush.msra.mxu0 %v2133_v5  ;;  %v2182_v5 = vsub.f32 %v2180_v43, %v2181_v28 }
 0x2ab   : > { %2332 = vmatpush.msra.mxu0 %v2139_v14  ;;  %v2183_v40 = vand.u32 4294901760, %v2182_v5  ;;  %v2204_v14 = vsub.f32 %v5038_v2, %v4444_v54  ;;  %v2216_v2 = vsub.f32 %v5040_v3, %v4454_v49  ;;  %v2223_v3 = vand.u32 4294901760, %v2222_v23 }
 0x2ac   : > { %v4512_v5 = vand.u32 4294901760, %v5046_v22 }
 0x2ad   : > { %2336 = vmatpush.msra.mxu0 %v2145_v52  ;;  %2184 = vmatpush.msrb.mxu1 %v2183_v40  ;;  %v2205_v52 = vand.u32 4294901760, %v2204_v14  ;;  %v2217_v39 = vand.u32 4294901760, %v2216_v2  ;;  %v2224_v8 = vsub.f32 %v2222_v23, %v2223_v3 }
 0x2ae   : > { %2270 = vmatpush.msrb.mxu2 %v2204_v14 }
 0x2af   : > { %2340 = vmatpush.msra.mxu0 %v2151_v53  ;;  %2190 = vmatpush.msrb.mxu1 %v2189_v38  ;;  %v2206_v27 = vsub.f32 %v2204_v14, %v2205_v52  ;;  %v2211_v53 = vand.u32 4294901760, %v2210_v47  ;;  %v2218_v35 = vsub.f32 %v2216_v2, %v2217_v39  ;;  %v2225_v43 = vand.u32 4294901760, %v2224_v8  ;;  %v5049_v38 = vld [vmem:[#allocation41_spill] sm:$0xff] }
 0x2b0   : > { %2273 = vmatpush.msrb.mxu2 %v2210_v47  ;;  %v5051_v14 = vld [vmem:[#allocation11_spill] sm:$0xff] }
 0x2b1   : > { %2344 = vmatpush.msra.mxu0 %v2157_v31  ;;  %2196 = vmatpush.msrb.mxu1 %v2195_v1  ;;  %v2207_v24 = vand.u32 4294901760, %v2206_v27  ;;  %v2212_v31 = vsub.f32 %v2210_v47, %v2211_v53  ;;  %v2219_v60 = vand.u32 4294901760, %v2218_v35 }
 0x2b2   : > { %2276 = vmatpush.msrb.mxu2 %v2216_v2 }
 0x2b3   : > { %2348 = vmatpush.msra.mxu0 %v2163_v13  ;;  %2202 = vmatpush.msrb.mxu1 %v2201_v12  ;;  %v2213_v13 = vand.u32 4294901760, %v2212_v31  ;;  %v4549_v12 = vand.u32 4294901760, %v5054_v55 }
 0x2b4   : > { %2279 = vmatpush.msrb.mxu2 %v2222_v23  ;;  %v2919_v23 = vld [vmem:[#allocation5 + $0xf0] sm:$0xff] }
 0x2b5   : > { %2352 = vmatpush.msra.mxu0 %v2169_v34  ;;  %2208 = vmatpush.msrb.mxu1 %v2207_v24  ;;  %v1544_v34 = vadd.f32 %v1543_v19, %v1490_v57 }
 0x2b6   : > { %2432 = vmatpush.msra.mxu2 %v4497_v7 }
 0x2b7   : > { %2356 = vmatpush.msra.mxu0 %v2175_v26  ;;  %2214 = vmatpush.msrb.mxu1 %v2213_v13  ;;  %v4504_v26 = vand.u32 4294901760, %v5044_v56 }
 0x2b8   : > { %2434 = vmatpush.msra.mxu2 %v4500_v50 }
 0x2b9   : > { %2360 = vmatpush.msra.mxu0 %v2181_v28  ;;  %2220 = vmatpush.msrb.mxu1 %v2219_v60  ;;  %v1583_v28 = vadd.f32 %v1582_v63, %v1544_v34  ;;  %v4590_v13 = vsub.f32 %v2920_v30, %v4504_v26 }
 0x2ba   : > { %2436 = vmatpush.msra.mxu2 %v4504_v26 }
 0x2bb   : > { %2364 = vmatpush.msra.mxu0 %v2187_v58  ;;  %2226 = vmatpush.msrb.mxu1 %v2225_v43  ;;  %v5047_v58 = vld [vmem:[#allocation39_spill] sm:$0xff]  ;;  %v2486_v34 = vand.u32 4294901760, %v4590_v13  ;;  %v4605_v43 = vsub.f32 %v5046_v22, %v4512_v5 }
 0x2bc   : > { %2438 = vmatpush.msra.mxu2 %v4508_v18  ;;  %v4517_v25 = vand.u32 4294901760, %v5047_v58 }
 0x2bd   : > { %2368 = vmatpush.msra.mxu0 %v2193_v51  ;;  %2395 = vmatpush.msra.mxu1 %v4374_v0  ;;  %v4522_v51 = vand.u32 4294901760, %v5048_v59  ;;  %v4527_v0 = vand.u32 4294901760, %v5049_v38  ;;  %v2487_v8 = vsub.f32 %v4590_v13, %v2486_v34 }
 0x2be   : > { %2440 = vmatpush.msra.mxu2 %v4512_v5  ;;  %v4609_v17 = vsub.f32 %v5047_v58, %v4517_v25 }
 0x2bf   : > { %2372 = vmatpush.msra.mxu0 %v2199_v42  ;;  %2397 = vmatpush.msra.mxu1 %v4384_v20  ;;  %v5050_v20 = vld [vmem:[#allocation42_spill] sm:$0xff] }
 0x2c0   : > { %2442 = vmatpush.msra.mxu2 %v4517_v25  ;;  %v4532_v42 = vand.u32 4294901760, %v5050_v20 }
 0x2c1   : > { %2376 = vmatpush.msra.mxu0 %v2205_v52  ;;  %2399 = vmatpush.msra.mxu1 %v4390_v45  ;;  %v5052_v45 = vld [vmem:[#allocation43_spill] sm:$0xff]  ;;  %v5053_v52 = vld [vmem:[#allocation44_spill] sm:$0xff] }
 0x2c2   : > { %2444 = vmatpush.msra.mxu2 %v4522_v51  ;;  %v4538_v1 = vand.u32 4294901760, %v5052_v45  ;;  %v4544_v47 = vand.u32 4294901760, %v5053_v52 }
 0x2c3   : > { %2380 = vmatpush.msra.mxu0 %v2211_v53  ;;  %2401 = vmatpush.msra.mxu1 %v4398_v21 }
 0x2c4   : > { %2446 = vmatpush.msra.mxu2 %v4527_v0 }
 0x2c5   : > { %2384 = vmatpush.msra.mxu0 %v2217_v39  ;;  %v1651_v32 = vpop.f32.mrf.mxu0  ;;  %2403 = vmatpush.msra.mxu1 %v4403_v62 }
 0x2c6   : > { %v1652_v40 = vadd.f32 %v1651_v32, %v1583_v28  ;;  %2448 = vmatpush.msra.mxu2 %v4532_v42  ;;  %v2488_v28 = vand.u32 4294901760, %v2487_v8  ;;  %v4653_v8 = vsub.f32 %v5053_v52, %v4544_v47 }
 0x2c7   : > { %2388 = vmatpush.msra.mxu0 %v2223_v3  ;;  %2405 = vmatpush.msra.mxu1 %v4408_v4  ;;  %v5055_v4 = vld [vmem:[#allocation46_spill] sm:$0xff] }
 0x2c8   : > { %2450 = vmatpush.msra.mxu2 %v4538_v1  ;;  %v4554_v53 = vand.u32 4294901760, %v5055_v4 }
 0x2c9   : > { %2407 = vmatpush.msra.mxu1 %v4414_v48  ;;  %v5056_v48 = vld [vmem:[#allocation48_spill] sm:$0xff] }
 0x2ca   : > { %2452 = vmatpush.msra.mxu2 %v4544_v47  ;;  %v4559_v57 = vand.u32 4294901760, %v5056_v48 }
 0x2cb   : > { %2409 = vmatpush.msra.mxu1 %v4419_v11  ;;  %v4564_v11 = vand.u32 4294901760, %v4213_v36 }
 0x2cc   : > { %2454 = vmatpush.msra.mxu2 %v4549_v12 }
 0x2cd   : > { %v1688_v44 = vpop.f32.mrf.mxu1  ;;  %2411 = vmatpush.msra.mxu1 %v4424_v9  ;;  %v4569_v9 = vand.u32 4294901760, %v4230_v15 }
 0x2ce   : > { %v1689_v37 = vadd.f32 %v1688_v44, %v1652_v40  ;;  %2456 = vmatpush.msra.mxu2 %v4554_v53  ;;  %v2498_v40 = vand.u32 4294901760, %v4605_v43  ;;  %v2504_v44 = vand.u32 4294901760, %v4609_v17 }
 0x2cf   : > { %2413 = vmatpush.msra.mxu1 %v4429_v29  ;;  %v2918_v29 = vld [vmem:[#allocation5 + $0xf8] sm:$0xff] }
 0x2d0   : > { %v2032_v6 = vmul.f32 %v5051_v14, %v1689_v37  ;;  %2458 = vmatpush.msra.mxu2 %v4559_v57  ;;  %v4618_v37 = vsub.f32 %v5048_v59, %v4522_v51  ;;  %v2499_v58 = vsub.f32 %v4605_v43, %v2498_v40 }
 0x2d1   : > { %2415 = vmatpush.msra.mxu1 %v4434_v46  ;;  %v4577_v46 = vsub.f32 %v2918_v29, %v4497_v7 }
 0x2d2   : > { %v2035_v10 = vsel %vm2034_vm11, %v2032_v6, 0.0  ;;  %2460 = vmatpush.msra.mxu2 %v4564_v11  ;;  %v2500_v59 = vand.u32 4294901760, %v2499_v58  ;;  %v2534_v58 = vand.u32 4294901760, %v4653_v8 }
 0x2d3   : > { %v2036_v21 = vrot.slane %v2035_v10, 4  ;;  %2417 = vmatpush.msra.mxu1 %v4439_v33  ;;  %v2474_v39 = vand.u32 4294901760, %v4577_v46  ;;  %v4582_v33 = vsub.f32 %v2919_v23, %v4500_v50 }
 0x2d4   : > { %2462 = vmatpush.msra.mxu2 %v4569_v9 }
 0x2d5   : > { %v2037_v62 = vadd.f32 %v2036_v21, %v2035_v10  ;;  %2419 = vmatpush.msra.mxu1 %v4444_v54  ;;  %v2475_v54 = vsub.f32 %v4577_v46, %v2474_v39  ;;  %v2505_v10 = vsub.f32 %v4609_v17, %v2504_v44  ;;  %v2510_v21 = vand.u32 4294901760, %v4618_v37 }
 0x2d7   : > { %v2038_v27 = vrot.slane %v2037_v62, 2  ;;  %2421 = vmatpush.msra.mxu1 %v4449_v16  ;;  %v2480_v16 = vand.u32 4294901760, %v4582_v33  ;;  %v2476_v3 = vand.u32 4294901760, %v2475_v54 }
 0x2d9   : > { %v2039_v2 = vadd.f32 %v2038_v27, %v2037_v62  ;;  %2423 = vmatpush.msra.mxu1 %v4454_v49  ;;  %v2481_v61 = vsub.f32 %v4582_v33, %v2480_v16  ;;  %2477 = vmatpush.msra.mxu3 %v2476_v3  ;;  %v4629_v62 = vsub.f32 %v5049_v38, %v4527_v0 }
 0x2db   : > { %v2040_v19 = vrot.slane %v2039_v2, 1  ;;  %2425 = vmatpush.msra.mxu1 %v4459_v41  ;;  %v2921_v41 = vld [vmem:[#allocation5 + $0xe0] sm:$0xff]  ;;  %v2482_v60 = vand.u32 4294901760, %v2481_v61 }
 0x2dc   : > { %v4597_v63 = vsub.f32 %v2921_v41, %v4508_v18 }
 0x2dd   : > { %v2041_v24 = vadd.f32 %v2040_v19, %v2039_v2  ;;  %2483 = vmatpush.msra.mxu3 %v2482_v60  ;;  %v2506_v2 = vand.u32 4294901760, %v2505_v10  ;;  %v2511_v19 = vsub.f32 %v4618_v37, %v2510_v21  ;;  %v4661_v10 = vsub.f32 %v5054_v55, %v4549_v12 }
 0x2de   : > { %v2492_v56 = vand.u32 4294901760, %v4597_v63 }
 0x2df   : > { %v2864_v31 = vmul.f32 -1.442695, %v2041_v24  ;;  %2489 = vmatpush.msra.mxu3 %v2488_v28  ;;  %v2516_v24 = vand.u32 4294901760, %v4629_v62  ;;  %v2512_v54 = vand.u32 4294901760, %v2511_v19 }
 0x2e0   : > { %v2493_v32 = vsub.f32 %v4597_v63, %v2492_v56 }
 0x2e1   : > { %2910 = vpow2.f32 %v2864_v31  ;;  %v4637_v31 = vsub.f32 %v5050_v20, %v4532_v42  ;;  %v2517_v38 = vsub.f32 %v4629_v62, %v2516_v24 }
 0x2e2   : > { %v2494_v22 = vand.u32 4294901760, %v2493_v32 }
 0x2e3   : > { %v2522_v30 = vand.u32 4294901760, %v4637_v31  ;;  %v2518_v20 = vand.u32 4294901760, %v2517_v38 }
 0x2e4   : > { %2495 = vmatpush.msra.mxu3 %v2494_v22 }
 0x2e5   : > { %v2523_v41 = vsub.f32 %v4637_v31, %v2522_v30 }
 0x2e6   : > { %2501 = vmatpush.msra.mxu3 %v2500_v59 }
 0x2e7   : > { %v2911_v35 = vpop.eup %2910 }
 0x2e8   : > { %v2055_v49 = vadd.f32 1.0, %v2911_v35  ;;  %v4645_v35 = vsub.f32 %v5052_v45, %v4538_v1  ;;  %2507 = vmatpush.msra.mxu3 %v2506_v2  ;;  %v2524_v45 = vand.u32 4294901760, %v2523_v41  ;;  %v2540_v2 = vand.u32 4294901760, %v4661_v10 }
 0x2ea   : > { %2912 = vrcp.f32 %v2055_v49  ;;  %v2068_v23 = vand.u32 2147483648, %v2055_v49  ;;  %v2066_v61 = vand.u32 2147483647, %v2055_v49  ;;  %v2528_v60 = vand.u32 4294901760, %v4645_v35  ;;  %2513 = vmatpush.msra.mxu3 %v2512_v54 }
 0x2eb   : > { %vm2062_vm13 = vweird.f32 %v2055_v49 }
 0x2ec   : > { %v2069_v32 = vor.u32 1.1754944e-38, %v2068_v23  ;;  %v2529_v22 = vsub.f32 %v4645_v35, %v2528_v60  ;;  %vm2067_vm15 = vcmp.eq.f32.partialorder %v2066_v61, 8.507059e+37  ;;  %2519 = vmatpush.msra.mxu3 %v2518_v20  ;;  %v4677_v23 = vsub.f32 %v5056_v48, %v4559_v57  ;;  %v1729_v48 = vpop.f32.mrf.mxu2 }
 0x2ee   : > { %v2530_v59 = vand.u32 4294901760, %v2529_v22  ;;  %2525 = vmatpush.msra.mxu3 %v2524_v45  ;;  %v1830_v22 = vpop.f32.mrf.mxu3 }
 0x2f0   : > { %v2913_v6 = vpop.eup %2912  ;;  %2531 = vmatpush.msra.mxu3 %v2530_v59 }
 0x2f1   : > { %v2058_v27 = vmul.f32 %v2913_v6, %v2055_v49  ;;  %vm2063_vm12 = vweird.f32 %v2913_v6  ;;  %v2535_v49 = vsub.f32 %v4653_v8, %v2534_v58 }
 0x2f2   : > { %vm2064_vm14 = vmor %vm2062_vm13, %vm2063_vm12 }
 0x2f3   : > { %v2059_v29 = vsub.f32 1.0, %v2058_v27  ;;  %v2536_v55 = vand.u32 4294901760, %v2535_v49 }
 0x2f5   : > { %v2060_v3 = vmul.f32 %v2913_v6, %v2059_v29  ;;  %v4670_v29 = vsub.f32 %v5055_v4, %v4554_v53  ;;  %v4683_v4 = vsub.f32 %v4213_v36, %v4564_v11  ;;  %2537 = vmatpush.msra.mxu3 %v2536_v55  ;;  %v4695_v36 = vsub.f32 %v4230_v15, %v4569_v9 }
 0x2f6   : > { %v1831_v55 = vadd.f32 %v1830_v22, %v1729_v48 }
 0x2f7   : > { %v2061_v28 = vadd.f32 %v2913_v6, %v2060_v3  ;;  %v2546_v38 = vand.u32 4294901760, %v4670_v29  ;;  %v2564_v59 = vand.u32 4294901760, %v4695_v36 }
 0x2f9   : > { %v2065_v27 = vsel %vm2064_vm14, %v2913_v6, %v2061_v28  ;;  %v2541_v6 = vsub.f32 %v4661_v10, %v2540_v2  ;;  %v2547_v20 = vsub.f32 %v4670_v29, %v2546_v38  ;;  %v2558_v28 = vand.u32 4294901760, %v4683_v4 }
 0x2fa   : > { %v2070_v52 = vsel %vm2067_vm15, %v2069_v32, %v2065_v27 }
 0x2fb   : > { %v2088_v19 = vmul.f32 %v5051_v14, %v2070_v52  ;;  %v2542_v3 = vand.u32 4294901760, %v2541_v6  ;;  %v2552_v14 = vand.u32 4294901760, %v4677_v23  ;;  %v2548_v45 = vand.u32 4294901760, %v2547_v20 }
 0x2fc   : > { %v2559_v52 = vsub.f32 %v4683_v4, %v2558_v28 }
 0x2fd   : > { %v2122_v54 = vand.u32 4294901760, %v2088_v19  ;;  %v2553_v41 = vsub.f32 %v4677_v23, %v2552_v14  ;;  %2543 = vmatpush.msra.mxu3 %v2542_v3 }
 0x2fe   : > { %v2560_v49 = vand.u32 4294901760, %v2559_v52 }
 0x2ff   : > { %2228 = vmatmul.f32.vlgmr.msrb.gmra.mxu1 %v2122_v54  ;;  %v2123_v61 = vsub.f32 %v2088_v19, %v2122_v54  ;;  %v2554_v27 = vand.u32 4294901760, %v2553_v41  ;;  %2549 = vmatpush.msra.mxu3 %v2548_v45  ;;  %v2565_v19 = vsub.f32 %v4695_v36, %v2564_v59 }
 0x300   : > { %2628 = vmatpush.msrb.mxu1 %v4497_v7 }
 0x301   : > { %2282 = vmatmul.f32.vlgmr.msrb.gmra.mxu2 %v2123_v61  ;;  %v2124_v32 = vand.u32 4294901760, %v2123_v61  ;;  %2555 = vmatpush.msra.mxu3 %v2554_v27  ;;  %v2566_v20 = vand.u32 4294901760, %v2565_v19 }
 0x302   : > { %2630 = vmatpush.msrb.mxu1 %v4500_v50  ;;  %2669 = vmatpush.msrb.mxu2 %v2474_v39 }
 0x303   : > { %2321 = vmatmul.f32.vlgmr.msrb.gmra.mxu3 %v2124_v32  ;;  %v2125_v15 = vsub.f32 %v2123_v61, %v2124_v32 }
 0x304   : > { %2632 = vmatpush.msrb.mxu1 %v4504_v26  ;;  %2673 = vmatpush.msrb.mxu2 %v2480_v16 }
 0x305   : > { %v2126_v6 = vand.u32 4294901760, %v2125_v15  ;;  %v1884_v3 = vpop.f32.mrf.mxu0  ;;  %2561 = vmatpush.msra.mxu3 %v2560_v49  ;;  %v2087_v15 = vld [vmem:[#allocation6] sm:$0xf] }
 0x306   : > { %2634 = vmatpush.msrb.mxu1 %v4508_v18  ;;  %v1885_v39 = vadd.f32 %v1884_v3, %v1831_v55  ;;  %2677 = vmatpush.msrb.mxu2 %v2486_v34 }
 0x307   : > { %2127 = vmatmul.f32.vlgmr.msrb.gmra.mxu0 %v2126_v6  ;;  %2427 = vmatmul.f32.vlgmr.msra.gmra.mxu1 %v2122_v54 }
 0x308   : > { %2575 = vmatpush.msrb.mxu0 %v4577_v46  ;;  %2636 = vmatpush.msrb.mxu1 %v4512_v5 }
 0x309   : > { %2567 = vmatpush.msra.mxu3 %v2566_v20  ;;  %2681 = vmatpush.msrb.mxu2 %v2492_v56 }
 0x30a   : > { %2578 = vmatpush.msrb.mxu0 %v4582_v33  ;;  %2638 = vmatpush.msrb.mxu1 %v4517_v25 }
 0x30b   : > { %2736 = vmatpush.msrb.mxu3 %v4497_v7  ;;  %2685 = vmatpush.msrb.mxu2 %v2498_v40  ;;  %v5057_v7 = vld [vmem:[#allocation12_spill] sm:$0xff] }
 0x30c   : > { %2581 = vmatpush.msrb.mxu0 %v4590_v13  ;;  %2640 = vmatpush.msrb.mxu1 %v4522_v51 }
 0x30d   : > { %v1923_v61 = vpop.f32.mrf.mxu1  ;;  %v1992_v48 = vpop.f32.mrf.mxu2  ;;  %2738 = vmatpush.msrb.mxu3 %v4500_v50  ;;  %2689 = vmatpush.msrb.mxu2 %v2504_v44 }
 0x30e   : > { %v1924_v16 = vadd.f32 %v1923_v61, %v1885_v39  ;;  %v2029_v41 = vpop.f32.mrf.mxu3  ;;  %2584 = vmatpush.msrb.mxu0 %v4597_v63  ;;  %2642 = vmatpush.msrb.mxu1 %v4527_v0 }
 0x30f   : > { %2390 = vmatmul.f32.vlgmr.msra.gmra.mxu0 %v2122_v54  ;;  %2740 = vmatpush.msrb.mxu3 %v4504_v26 }
 0x310   : > { %v1993_v46 = vadd.f32 %v1992_v48, %v1924_v16  ;;  %2587 = vmatpush.msrb.mxu0 %v4605_v43  ;;  %2644 = vmatpush.msrb.mxu1 %v4532_v42 }
 0x311   : > { %2742 = vmatpush.msrb.mxu3 %v4508_v18  ;;  %2693 = vmatpush.msrb.mxu2 %v2510_v21 }
 0x312   : > { %v2030_v33 = vadd.f32 %v2029_v41, %v1993_v46  ;;  %2590 = vmatpush.msrb.mxu0 %v4609_v17  ;;  %2646 = vmatpush.msrb.mxu1 %v4538_v1 }
 0x313   : > { %2744 = vmatpush.msrb.mxu3 %v4512_v5  ;;  %2697 = vmatpush.msrb.mxu2 %v2516_v24 }
 0x314   : > { %v2033_v13 = vmul.f32 %v5057_v7, %v2030_v33  ;;  %2593 = vmatpush.msrb.mxu0 %v4618_v37  ;;  %2648 = vmatpush.msrb.mxu1 %v4544_v47 }
 0x315   : > { %2746 = vmatpush.msrb.mxu3 %v4517_v25  ;;  %2701 = vmatpush.msrb.mxu2 %v2522_v30 }
 0x316   : > { %v2042_v50 = vsel %vm2034_vm11, %v2033_v13, 0.0  ;;  %2596 = vmatpush.msrb.mxu0 %v4629_v62  ;;  %2650 = vmatpush.msrb.mxu1 %v4549_v12 }
 0x317   : > { %v2043_v26 = vrot.slane %v2042_v50, 4  ;;  %2748 = vmatpush.msrb.mxu3 %v4522_v51  ;;  %2705 = vmatpush.msrb.mxu2 %v2528_v60 }
 0x318   : > { %2599 = vmatpush.msrb.mxu0 %v4637_v31  ;;  %2652 = vmatpush.msrb.mxu1 %v4554_v53 }
 0x319   : > { %v2044_v18 = vadd.f32 %v2043_v26, %v2042_v50  ;;  %2750 = vmatpush.msrb.mxu3 %v4527_v0  ;;  %2709 = vmatpush.msrb.mxu2 %v2534_v58 }
 0x31a   : > { %2602 = vmatpush.msrb.mxu0 %v4645_v35  ;;  %2654 = vmatpush.msrb.mxu1 %v4559_v57 }
 0x31b   : > { %v2045_v5 = vrot.slane %v2044_v18, 2  ;;  %2752 = vmatpush.msrb.mxu3 %v4532_v42  ;;  %2713 = vmatpush.msrb.mxu2 %v2540_v2 }
 0x31c   : > { %2605 = vmatpush.msrb.mxu0 %v4653_v8  ;;  %2656 = vmatpush.msrb.mxu1 %v4564_v11 }
 0x31d   : > { %v2046_v25 = vadd.f32 %v2045_v5, %v2044_v18  ;;  %2754 = vmatpush.msrb.mxu3 %v4538_v1  ;;  %2717 = vmatpush.msrb.mxu2 %v2546_v38 }
 0x31e   : > { %2608 = vmatpush.msrb.mxu0 %v4661_v10  ;;  %2658 = vmatpush.msrb.mxu1 %v4569_v9 }
 0x31f   : > { %v2047_v51 = vrot.slane %v2046_v25, 1  ;;  %2756 = vmatpush.msrb.mxu3 %v4544_v47  ;;  %2721 = vmatpush.msrb.mxu2 %v2552_v14 }
 0x320   : > { %2611 = vmatpush.msrb.mxu0 %v4670_v29 }
 0x321   : > { %v2048_v0 = vadd.f32 %v2047_v51, %v2046_v25  ;;  %2758 = vmatpush.msrb.mxu3 %v4549_v12  ;;  %2725 = vmatpush.msrb.mxu2 %v2558_v28 }
 0x322   : > { %2614 = vmatpush.msrb.mxu0 %v4677_v23 }
 0x323   : > { %v2865_v42 = vmul.f32 -1.442695, %v2048_v0  ;;  %2760 = vmatpush.msrb.mxu3 %v4554_v53  ;;  %2729 = vmatpush.msrb.mxu2 %v2564_v59 }
 0x324   : > { %2617 = vmatpush.msrb.mxu0 %v4683_v4 }
 0x325   : > { %2914 = vpow2.f32 %v2865_v42  ;;  %2762 = vmatpush.msrb.mxu3 %v4559_v57 }
 0x326   : > { %2620 = vmatpush.msrb.mxu0 %v4695_v36 }
 0x327   : > { %2764 = vmatpush.msrb.mxu3 %v4564_v11 }
 0x329   : > { %2766 = vmatpush.msrb.mxu3 %v4569_v9 }
 0x32b   : > { %v2915_v1 = vpop.eup %2914 }
 0x32c   : > { %v2056_v47 = vadd.f32 1.0, %v2915_v1 }
 0x32e   : > { %2916 = vrcp.f32 %v2056_v47  ;;  %v2083_v63 = vand.u32 2147483648, %v2056_v47  ;;  %v2081_v43 = vand.u32 2147483647, %v2056_v47  ;;  %vm2077_vm1 = vweird.f32 %v2056_v47 }
 0x330   : > { %v2084_v17 = vor.u32 1.1754944e-38, %v2083_v63  ;;  %vm2082_vm3 = vcmp.eq.f32.partialorder %v2081_v43, 8.507059e+37 }
 0x334   : > { %v2917_v12 = vpop.eup %2916 }
 0x335   : > { %v2073_v53 = vmul.f32 %v2917_v12, %v2056_v47  ;;  %vm2078_vm0 = vweird.f32 %v2917_v12 }
 0x336   : > { %vm2079_vm2 = vmor %vm2077_vm1, %vm2078_vm0 }
 0x337   : > { %v2074_v34 = vsub.f32 1.0, %v2073_v53 }
 0x339   : > { %v2075_v56 = vmul.f32 %v2917_v12, %v2074_v34 }
 0x33b   : > { %v2076_v57 = vadd.f32 %v2917_v12, %v2075_v56 }
 0x33d   : > { %v2080_v40 = vsel %vm2079_vm2, %v2917_v12, %v2076_v57 }
 0x33e   : > { %v2085_v44 = vsel %vm2082_vm3, %v2084_v17, %v2080_v40 }
 0x33f   : > { %v2089_v11 = vmul.f32 %v5057_v7, %v2085_v44 }
 0x341   : > { %v2463_v37 = vand.u32 4294901760, %v2089_v11 }
 0x343   : > { %2569 = vmatmul.f32.vlgmr.msra.gmra.mxu3 %v2463_v37  ;;  %v2464_v9 = vsub.f32 %v2089_v11, %v2463_v37 }
 0x345   : > { %2623 = vmatmul.f32.vlgmr.msrb.gmra.mxu0 %v2464_v9  ;;  %v2465_v21 = vand.u32 4294901760, %v2464_v9 }
 0x347   : > { %2662 = vmatmul.f32.vlgmr.msrb.gmra.mxu1 %v2465_v21  ;;  %v2466_v62 = vsub.f32 %v2464_v9, %v2465_v21 }
 0x349   : > { %v2467_v24 = vand.u32 4294901760, %v2466_v62 }
 0x34b   : > { %2468 = vmatmul.f32.vlgmr.msra.gmra.mxu2 %v2467_v24  ;;  %2768 = vmatmul.f32.vlgmr.msrb.gmra.mxu3 %v2463_v37 }
 0x353   : > { %2731 = vmatmul.f32.vlgmr.msrb.gmra.mxu2 %v2463_v37 }
 0x37c   : > { %v2229_v30 = vpop.f32.mrf.mxu1 }
 0x384   : > { %v2128_v31 = vpop.f32.mrf.mxu0  ;;  %v2283_v60 = vpop.f32.mrf.mxu2 }
 0x385   : > { %v2230_v35 = vadd.f32 %v2229_v30, %v2128_v31  ;;  %v2428_v23 = vpop.f32.mrf.mxu1 }
 0x386   : > { %v2322_v58 = vpop.f32.mrf.mxu3 }
 0x387   : > { %v2284_v8 = vadd.f32 %v2283_v60, %v2230_v35 }
 0x389   : > { %v2323_v2 = vadd.f32 %v2322_v58, %v2284_v8 }
 0x38c   : > { %v2391_v10 = vpop.f32.mrf.mxu0 }
 0x38d   : > { %v2392_v29 = vadd.f32 %v2391_v10, %v2323_v2 }
 0x38f   : > { %v2429_v54 = vadd.f32 %v2428_v23, %v2392_v29 }
 0x3c2   : > { %v2624_v36 = vpop.f32.mrf.mxu0 }
 0x3c4   : > { %v2663_v45 = vpop.f32.mrf.mxu1 }
 0x3c6   : > { %v2570_v38 = vpop.f32.mrf.mxu3 }
 0x3ce   : > { %v2469_v14 = vpop.f32.mrf.mxu2  ;;  %v2769_v59 = vpop.f32.mrf.mxu3 }
 0x3cf   : > { %v2470_v4 = vadd.f32 %v2469_v14, %v2429_v54 }
 0x3d1   : > { %v2571_v28 = vadd.f32 %v2570_v38, %v2470_v4 }
 0x3d3   : > { %v2625_v32 = vadd.f32 %v2624_v36, %v2571_v28 }
 0x3d5   : > { %v2664_v22 = vadd.f32 %v2663_v45, %v2625_v32 }
 0x3d6   : > { %v2732_v27 = vpop.f32.mrf.mxu2 }
 0x3d7   : > { %v2733_v52 = vadd.f32 %v2732_v27, %v2664_v22 }
 0x3d9   : > { %v2770_v49 = vadd.f32 %v2769_v59, %v2733_v52 }
 0x3db   : > { %v2772_v19 = vadd.f32 %v2770_v49, %v2087_v15 }
 0x3dd   : > { %2774 = vst.msk [vmem:[#allocation6] sm:$0xf] %vm2773_vm4, %v2772_v19 }
 0x3de PF: > { %p2874_p6 = scmp.eq.s32.totalorder %s2848_s15, 1  ;;  %s2783_s26 = sshll.u32 %s4803_s3, 4  ;;  %s2784_s26 = int_to_ptr.hbm [resolvable:$true] %s2783_s26 }
 0x3df   : > { %s2982_s27 = smov [#allocation6]  }
 0x3e0   : > { %s2781_s28 = sshll.u32 %s2982_s27, 4  ;;  %s2782_s28 = int_to_ptr.vmem [resolvable:$true] %s2781_s28 }
 0x3e1   : > { %2871 = dma.vmem_to_hbm [thread:$0]  (%p2874_p6), %s2782_s28, 64, %s2784_s26, [#allocation7]  }
 0x3e2   : > { %2963 = dma.done.wait (%p2874_p6), [#allocation7], 64  }
 0x3e3   : > { %2965 = vsyncadd (%p2874_p6), [#allocation7], 4294967232 }
 0x3e4 PF: > { %s14_s14 = sadd.s32 1, %s2976_s14   ;;  %s5058_s12 = smov %s2972_s13 }
 0x3e5   : > { %p11_p7 = scmp.ge.s32.totalorder %s14_s14, 4   ;;  %s5059_s13 = smov %s5061_s16 }
 0x3e7   :  { %13 = sbr.rel (!%p11_p7) target bundleno = 2 (0x2), region = 80 }
 0x3ec   :  { %2797 = vsyncpa [#allocation7], 1 }
 0x3ed   :  { %2799 = vsyncpa [#allocation7 + $0x1], 1 }

</bundles_post_ra>
